<compile_context>
chip_gen: v7x
topology: tpu7x:2x2x1
jax: 0.10.0
libtpu: 0.0.40
codegen_flags: <defaults>
</compile_context>

<pallas_src>
import functools
import math

import jax
import jax.numpy as jnp
from jax import lax
from jax.experimental import pallas as pl
from jax.experimental.pallas import tpu as pltpu

_VMEM_LIMIT = 48 * 1024 * 1024


# ----------------------------------------------------------------------------
# tiling helpers
# ----------------------------------------------------------------------------
def _row_tile(n, max_tile=512, align=16):
    """Return (n_padded, row_tile). Pads n up instead of one-giant-block fallback."""
    if n <= max_tile:
        return n, n
    t = max_tile - (max_tile % align)
    while t >= align:
        if n % t == 0:
            return n, t
        t -= align
    n_pad = -(-n // max_tile) * max_tile
    return n_pad, max_tile


def _col_tile(n, max_tile=512):
    """Largest 128-aligned divisor of n (or n itself if small / no divisor)."""
    if n <= max_tile:
        return n
    t = max_tile - (max_tile % 128)
    while t >= 128:
        if n % t == 0:
            return t
        t -= 128
    return n  # full-width fallback (equal to full dim is always legal)


def _seq_tile(l, max_tile=256):
    if l <= max_tile:
        return l
    t = max_tile - (max_tile % 128)
    while t >= 128:
        if l % t == 0:
            return t
        t -= 128
    return l


def _pad_rows(x2d, n_pad):
    n = x2d.shape[0]
    if n_pad == n:
        return x2d
    return jnp.pad(x2d, ((0, n_pad - n), (0, 0)))


# ----------------------------------------------------------------------------
# Pallas kernels
# ----------------------------------------------------------------------------
def _linear_kernel(x_ref, w_ref, b_ref, o_ref):
    # y = x @ W + b ; x cast to bf16 at the MXU boundary, f32 accumulation.
    x = x_ref[...].astype(jnp.bfloat16)
    o_ref[...] = (
        jnp.dot(x, w_ref[...], preferred_element_type=jnp.float32) + b_ref[...]
    ).astype(o_ref.dtype)


def linear(x2d, w, b, out_dtype=jnp.float32):
    """Row- and column-tiled linear.  w is bf16."""
    n, din = x2d.shape
    dout = w.shape[1]
    n_pad, tn = _row_tile(n)
    tc = _col_tile(dout)
    xp = _pad_rows(x2d, n_pad)
    out = pl.pallas_call(
        _linear_kernel,
        out_shape=jax.ShapeDtypeStruct((n_pad, dout), out_dtype),
        grid=(n_pad // tn, dout // tc),
        in_specs=[
            pl.BlockSpec((tn, din), lambda i, j: (i, 0)),
            pl.BlockSpec((din, tc), lambda i, j: (0, j)),
            pl.BlockSpec((1, tc), lambda i, j: (0, j)),
        ],
        out_specs=pl.BlockSpec((tn, tc), lambda i, j: (i, j)),
        compiler_params=pltpu.CompilerParams(
            dimension_semantics=("parallel", "parallel"),
            vmem_limit_bytes=_VMEM_LIMIT),
    )(xp, w, b.reshape(1, dout))
    return out[:n] if n_pad != n else out


def _linear_add_ln_kernel(x_ref, w_ref, b_ref, r_ref, g_ref, bt_ref, o_ref):
    # out = LayerNorm( (x @ W + b) + residual ) * gamma + beta   (eps = 1e-5)
    z = jnp.dot(x_ref[...].astype(jnp.bfloat16), w_ref[...],
                preferred_element_type=jnp.float32) + b_ref[...]
    y = z + r_ref[...]
    mean = jnp.mean(y, axis=-1, keepdims=True)
    var = jnp.mean((y - mean) ** 2, axis=-1, keepdims=True)
    o_ref[...] = (y - mean) * lax.rsqrt(var + 1e-5) * g_ref[...] + bt_ref[...]


def linear_add_ln(x2d, w, b, resid2d, gamma, beta):
    n, din = x2d.shape
    dout = w.shape[1]
    n_pad, tn = _row_tile(n)
    xp = _pad_rows(x2d, n_pad)
    rp = _pad_rows(resid2d, n_pad)
    out = pl.pallas_call(
        _linear_add_ln_kernel,
        out_shape=jax.ShapeDtypeStruct((n_pad, dout), jnp.float32),
        grid=(n_pad // tn,),
        in_specs=[
            pl.BlockSpec((tn, din), lambda i: (i, 0)),
            pl.BlockSpec((din, dout), lambda i: (0, 0)),
            pl.BlockSpec((1, dout), lambda i: (0, 0)),
            pl.BlockSpec((tn, dout), lambda i: (i, 0)),
            pl.BlockSpec((1, dout), lambda i: (0, 0)),
            pl.BlockSpec((1, dout), lambda i: (0, 0)),
        ],
        out_specs=pl.BlockSpec((tn, dout), lambda i: (i, 0)),
        compiler_params=pltpu.CompilerParams(
            dimension_semantics=("parallel",),
            vmem_limit_bytes=_VMEM_LIMIT),
    )(xp, w, b.reshape(1, dout), rp,
      gamma.reshape(1, dout), beta.reshape(1, dout))
    return out[:n] if n_pad != n else out


def _ffn_add_ln_kernel(x_ref, w1_ref, b1_ref, w2_ref, b2_ref, g_ref, bt_ref,
                       o_ref, acc_ref):
    # out = LayerNorm( (relu(x@W1+b1) @ W2 + b2) + x ) * gamma + beta
    # K-tiled over d_ff: acc accumulates the second matmul across d_ff chunks.
    k = pl.program_id(1)

    @pl.when(k == 0)
    def _():
        acc_ref[...] = jnp.zeros_like(acc_ref)

    xb = x_ref[...].astype(jnp.bfloat16)
    hchunk = jnp.dot(xb, w1_ref[...], preferred_element_type=jnp.float32) + b1_ref[...]
    hchunk = jnp.maximum(hchunk, 0.0).astype(jnp.bfloat16)
    acc_ref[...] += jnp.dot(hchunk, w2_ref[...], preferred_element_type=jnp.float32)

    @pl.when(k == pl.num_programs(1) - 1)
    def _():
        y = acc_ref[...] + b2_ref[...] + x_ref[...].astype(jnp.float32)
        mean = jnp.mean(y, axis=-1, keepdims=True)
        var = jnp.mean((y - mean) ** 2, axis=-1, keepdims=True)
        o_ref[...] = ((y - mean) * lax.rsqrt(var + 1e-5)
                      * g_ref[...] + bt_ref[...]).astype(o_ref.dtype)


def ffn_add_ln(x2d, w1, b1, w2, b2, gamma, beta):
    n, d_model = x2d.shape
    d_ff = w1.shape[1]
    n_pad, tn = _row_tile(n)
    tf = _col_tile(d_ff)
    xp = _pad_rows(x2d, n_pad)
    out = pl.pallas_call(
        _ffn_add_ln_kernel,
        out_shape=jax.ShapeDtypeStruct((n_pad, d_model), jnp.float32),
        grid=(n_pad // tn, d_ff // tf),
        in_specs=[
            pl.BlockSpec((tn, d_model), lambda i, k: (i, 0)),
            pl.BlockSpec((d_model, tf), lambda i, k: (0, k)),
            pl.BlockSpec((1, tf), lambda i, k: (0, k)),
            pl.BlockSpec((tf, d_model), lambda i, k: (k, 0)),
            pl.BlockSpec((1, d_model), lambda i, k: (0, 0)),
            pl.BlockSpec((1, d_model), lambda i, k: (0, 0)),
            pl.BlockSpec((1, d_model), lambda i, k: (0, 0)),
        ],
        out_specs=pl.BlockSpec((tn, d_model), lambda i, k: (i, 0)),
        scratch_shapes=[pltpu.VMEM((tn, d_model), jnp.float32)],
        compiler_params=pltpu.CompilerParams(
            dimension_semantics=("parallel", "arbitrary"),
            vmem_limit_bytes=_VMEM_LIMIT),
    )(xp, w1, b1.reshape(1, d_ff), w2, b2.reshape(1, d_model),
      gamma.reshape(1, d_model), beta.reshape(1, d_model))
    return out[:n] if n_pad != n else out


def _attn_kernel(pmq_ref, pmk_ref, q_ref, k_ref, v_ref, o_ref, *,
                 h, d_k, scale, causal):
    # One (batch, q-block) tile per program.  Heads are processed on the
    # concatenated (tq, h*d_k) layout; all head outputs are concatenated and
    # written with ONE lane-dense store.  Mask is built in-kernel (no HBM bias).
    qi = pl.program_id(1)
    tq = q_ref.shape[0]
    lk = k_ref.shape[0]

    # --- additive mask, reproducing the PyTorch padding semantics exactly ----
    pmq = pmq_ref[...]                       # (tq, 1) f32 of 0/1
    pmk = pmk_ref[...]                       # (1, lk) f32 of 0/1
    pad = pmq * pmk                          # (tq, lk)
    zero_rows = jnp.sum(pad, axis=-1, keepdims=True) == 0.0
    pad = jnp.where(zero_rows, 1.0, pad)     # fully-masked rows -> attend all
    bias = jnp.where(pad == 0.0, -jnp.inf, 0.0)
    if causal:
        row = lax.broadcasted_iota(jnp.int32, (tq, lk), 0) + qi * tq
        col = lax.broadcasted_iota(jnp.int32, (tq, lk), 1)
        bias = jnp.where(col > row, -jnp.inf, bias)

    # scale folded into q before the QK matmul
    inv_scale = 1.0 / scale
    q = (q_ref[...] * inv_scale).astype(jnp.bfloat16)   # (tq, H)
    k = k_ref[...].astype(jnp.bfloat16)                  # (lk, H)
    v = v_ref[...].astype(jnp.bfloat16)                  # (lk, H)

    outs = []
    for hd in range(h):                      # static unroll, h compile-time const
        sl = slice(hd * d_k, (hd + 1) * d_k)
        qh, kh, vh = q[:, sl], k[:, sl], v[:, sl]
        # contract on the last dims -> no explicit transpose of kh
        s = lax.dot_general(qh, kh, (((1,), (1,)), ((), ())),
                            preferred_element_type=jnp.float32) + bias
        m = jnp.max(s, axis=-1, keepdims=True)
        p = jnp.exp(s - m)
        denom = jnp.sum(p, axis=-1, keepdims=True)
        acc = jnp.dot(p.astype(jnp.bfloat16), vh,
                      preferred_element_type=jnp.float32)     # (tq, d_k)
        # deferred softmax normalization on the small (tq, d_k) tile
        outs.append(acc * pl.reciprocal(denom, approx=True))

    o_ref[...] = jnp.concatenate(outs, axis=-1).astype(o_ref.dtype)


def attention(q, k, v, pm_q, pm_k, h, d_k, scale, causal):
    """q/k/v: (B, L, h*d_k) bf16.  pm_q/pm_k: (B, L) 0/1 pad masks."""
    b, lq, H = q.shape
    lk = k.shape[1]
    tq = _seq_tile(lq)
    pmq3 = pm_q.astype(jnp.float32).reshape(b, lq, 1)
    pmk3 = pm_k.astype(jnp.float32).reshape(b, 1, lk)
    return pl.pallas_call(
        functools.partial(_attn_kernel, h=h, d_k=d_k, scale=scale, causal=causal),
        out_shape=jax.ShapeDtypeStruct((b, lq, H), jnp.bfloat16),
        grid=(b, lq // tq),
        in_specs=[
            pl.BlockSpec((None, tq, 1), lambda bi, qi: (bi, qi, 0)),
            pl.BlockSpec((None, 1, lk), lambda bi, qi: (bi, 0, 0)),
            pl.BlockSpec((None, tq, H), lambda bi, qi: (bi, qi, 0)),
            pl.BlockSpec((None, lk, H), lambda bi, qi: (bi, 0, 0)),
            pl.BlockSpec((None, lk, H), lambda bi, qi: (bi, 0, 0)),
        ],
        out_specs=pl.BlockSpec((None, tq, H), lambda bi, qi: (bi, qi, 0)),
        compiler_params=pltpu.CompilerParams(
            dimension_semantics=("parallel", "parallel"),
            vmem_limit_bytes=_VMEM_LIMIT),
    )(pmq3, pmk3, q, k, v)


# ----------------------------------------------------------------------------
# JAX glue (embedding gather, block stacking)
# ----------------------------------------------------------------------------
def mha_self(p, x, pm, h, d_k, causal, ln_g, ln_b):
    b, l, d_model = x.shape
    H = h * d_k
    qkv = linear(x.reshape(-1, d_model), p["wqkv"], p["bqkv"],
                 out_dtype=jnp.bfloat16).reshape(b, l, 3 * H)
    q, k, v = qkv[..., :H], qkv[..., H:2 * H], qkv[..., 2 * H:]
    att = attention(q, k, v, pm, pm, h, d_k, math.sqrt(d_k), causal)   # (B,L,H) bf16
    # output projection fused with residual-add + LayerNorm
    return linear_add_ln(att.reshape(-1, H), p["wo"], p["bo"],
                         x.reshape(-1, d_model), ln_g, ln_b).reshape(b, l, d_model)


def mha_cross(p, x, enc, pm_q, pm_k, h, d_k, ln_g, ln_b):
    b, l, d_model = x.shape
    le = enc.shape[1]
    H = h * d_k
    q = linear(x.reshape(-1, d_model), p["wq"], p["bq"],
               out_dtype=jnp.bfloat16).reshape(b, l, H)
    kv = linear(enc.reshape(-1, d_model), p["wkv"], p["bkv"],
                out_dtype=jnp.bfloat16).reshape(b, le, 2 * H)
    k, v = kv[..., :H], kv[..., H:]
    att = attention(q, k, v, pm_q, pm_k, h, d_k, math.sqrt(d_k), False)
    return linear_add_ln(att.reshape(-1, H), p["wo"], p["bo"],
                         x.reshape(-1, d_model), ln_g, ln_b).reshape(b, l, d_model)


def encoder_block(p, x, pm, h, d_k):
    b, l, d = x.shape
    x = mha_self(p["mha"], x, pm, h, d_k, False, p["ln1_g"], p["ln1_b"])
    x = ffn_add_ln(x.reshape(-1, d), p["w1"], p["b1"], p["w2"], p["b2"],
                   p["ln2_g"], p["ln2_b"]).reshape(b, l, d)
    return x


def decoder_block(p, x, enc_out, dec_pm, enc_pm, h, d_k):
    b, l, d = x.shape
    x = mha_self(p["masked_mha"], x, dec_pm, h, d_k, True, p["ln1_g"], p["ln1_b"])
    x = mha_cross(p["encdec_mha"], x, enc_out, dec_pm, enc_pm, h, d_k,
                  p["ln2_g"], p["ln2_b"])
    x = ffn_add_ln(x.reshape(-1, d), p["w1"], p["b1"], p["w2"], p["b2"],
                   p["ln3_g"], p["ln3_b"]).reshape(b, l, d)
    return x


def positional_encoding_table(max_len, d_model):
    pos = jnp.arange(max_len, dtype=jnp.float32)[:, None]
    i = jnp.arange(d_model, dtype=jnp.float32)[None, :]
    angle = pos / jnp.power(10000.0, (2.0 * jnp.floor(i / 2.0)) / d_model)
    return jnp.where(jnp.arange(d_model)[None, :] % 2 == 0,
                     jnp.sin(angle), jnp.cos(angle))


def embed_inputs(params, ids):
    b, l = ids.shape
    embs = jnp.take(params["emb_table"], ids.reshape(-1), axis=0).reshape(b, l, -1)
    return embs + params["pos_table"][:l, :]


def transformer_forward(params, cfg, encoder_x, decoder_x, enc_pad_mask,
                        dec_pad_mask, logits=True):
    h, d_k = cfg["h"], cfg["d_k"]
    b, _ = encoder_x.shape
    ld = decoder_x.shape[1]

    enc_h = embed_inputs(params, encoder_x)    # dropout == identity (eval)
    dec_h = embed_inputs(params, decoder_x)

    enc_out = enc_h
    for p in params["enc_blocks"]:
        enc_out = encoder_block(p, enc_out, enc_pad_mask, h, d_k)

    dec_out = dec_h
    for p in params["dec_blocks"]:
        dec_out = decoder_block(p, dec_out, enc_out, dec_pad_mask, enc_pad_mask,
                                h, d_k)

    d_model = dec_out.shape[-1]
    out = linear(dec_out.reshape(-1, d_model), params["w_out"], params["b_out"])
    out = out.reshape(b, ld, -1)
    if not logits:
        out = jax.nn.softmax(out, axis=-1)
    return out


# ----------------------------------------------------------------------------
# Deterministic parameter initialization (weights stored in bf16 for the MXU)
# ----------------------------------------------------------------------------
def init_params(key, cfg):
    h, d_model, d_k, d_ff = cfg["h"], cfg["d_model"], cfg["d_k"], cfg["d_ff"]
    n_vocab, max_ctx, n_blocks = cfg["n_vocab"], cfg["max_context_len"], cfg["n_blocks"]
    H = h * d_k

    def nxt():
        nonlocal key
        key, sub = jax.random.split(key)
        return sub

    def lin(din, dout):
        w = (jax.random.normal(nxt(), (din, dout), jnp.float32) * 0.05
             ).astype(jnp.bfloat16)
        b = jax.random.normal(nxt(), (dout,), jnp.float32) * 0.05
        return w, b

    def mha_self_params():
        wqkv, bqkv = lin(d_model, 3 * H)      # fused Q|K|V projection
        wo, bo = lin(H, d_model)
        return dict(wqkv=wqkv, bqkv=bqkv, wo=wo, bo=bo)

    def mha_cross_params():
        wq, bq = lin(d_model, H)
        wkv, bkv = lin(d_model, 2 * H)        # fused K|V projection
        wo, bo = lin(H, d_model)
        return dict(wq=wq, bq=bq, wkv=wkv, bkv=bkv, wo=wo, bo=bo)

    def ln_params():
        return jnp.ones((d_model,), jnp.float32), jnp.zeros((d_model,), jnp.float32)

    enc_blocks = []
    for _ in range(n_blocks):
        w1, b1 = lin(d_model, d_ff)
        w2, b2 = lin(d_ff, d_model)
        g1, bb1 = ln_params()
        g2, bb2 = ln_params()
        enc_blocks.append(dict(mha=mha_self_params(), w1=w1, b1=b1, w2=w2, b2=b2,
                               ln1_g=g1, ln1_b=bb1, ln2_g=g2, ln2_b=bb2))

    dec_blocks = []
    for _ in range(n_blocks):
        w1, b1 = lin(d_model, d_ff)
        w2, b2 = lin(d_ff, d_model)
        g1, bb1 = ln_params()
        g2, bb2 = ln_params()
        g3, bb3 = ln_params()
        dec_blocks.append(dict(masked_mha=mha_self_params(),
                               encdec_mha=mha_cross_params(),
                               w1=w1, b1=b1, w2=w2, b2=b2,
                               ln1_g=g1, ln1_b=bb1, ln2_g=g2, ln2_b=bb2,
                               ln3_g=g3, ln3_b=bb3))

    # stored as (n_vocab, d_model): gather rows directly, no runtime transpose
    emb_table = jax.random.normal(nxt(), (n_vocab, d_model), jnp.float32)
    pos_table = positional_encoding_table(max_ctx, d_model)
    w_out, b_out = lin(d_model, n_vocab)

    return dict(enc_blocks=enc_blocks, dec_blocks=dec_blocks,
                emb_table=emb_table, pos_table=pos_table,
                w_out=w_out, b_out=b_out)


# ----------------------------------------------------------------------------
if __name__ == "__main__":
    cfg = dict(n_blocks=2, h=2, d_model=32, d_k=16, d_ff=64,
               n_vocab=64, max_context_len=32)

    key = jax.random.PRNGKey(0)
    params = init_params(key, cfg)

    B, Le, Ld = 2, 8, 8
    k1, k2 = jax.random.split(jax.random.PRNGKey(0))
    encoder_x = jax.random.randint(k1, (B, Le), 0, cfg["n_vocab"])
    decoder_x = jax.random.randint(k2, (B, Ld), 0, cfg["n_vocab"])
    enc_pad_mask = jnp.array([[1, 1, 1, 1, 1, 1, 0, 0],
                              [1, 1, 1, 1, 1, 1, 1, 1]], jnp.int32)
    dec_pad_mask = jnp.array([[1, 1, 1, 1, 1, 0, 0, 0],
                              [1, 1, 1, 1, 1, 1, 1, 0]], jnp.int32)

    fwd = jax.jit(functools.partial(transformer_forward, params, cfg))
    out = fwd(encoder_x, decoder_x, enc_pad_mask, dec_pad_mask)
    out = jax.block_until_ready(out)

    assert out.shape == (B, Ld, cfg["n_vocab"])
    assert bool(jnp.all(jnp.isfinite(out)))
    print("KERNEL_OK")
</pallas_src>

<mosaic_0001>
module attributes {stable_mosaic.version = 11 : i64} {
  func.func @_linear_kernel(%arg0: i32, %arg1: i32, %arg2: memref<16x32xf32, #tpu.memory_space<vmem>>, %arg3: memref<32x96xbf16, #tpu.memory_space<vmem>>, %arg4: memref<1x96xf32, #tpu.memory_space<vmem>>, %arg5: memref<16x96xbf16, #tpu.memory_space<vmem>>) attributes {dimension_semantics = [#tpu.dimension_semantics<parallel>, #tpu.dimension_semantics<parallel>], iteration_bounds = array<i64: 1, 1>, scalar_prefetch = 0 : i64, scratch_operands = 0 : i64, tpu.core_type = #tpu.core_type<tc>, window_params = [{transform_indices = @transform_0, window_bounds = array<i64: 16, 32>}, {transform_indices = @transform_1, window_bounds = array<i64: 32, 96>}, {transform_indices = @transform_2, window_bounds = array<i64: 1, 96>}, {transform_indices = @transform_3, window_bounds = array<i64: 16, 96>}]} {
    %c0 = arith.constant 0 : index
    %c0_0 = arith.constant 0 : index
    %0 = vector.load %arg2[%c0, %c0_0] : memref<16x32xf32, #tpu.memory_space<vmem>>, vector<16x32xf32>
    %1 = arith.truncf %0 : vector<16x32xf32> to vector<16x32xbf16>
    %c0_1 = arith.constant 0 : index
    %c0_2 = arith.constant 0 : index
    %2 = vector.load %arg3[%c0_1, %c0_2] : memref<32x96xbf16, #tpu.memory_space<vmem>>, vector<32x96xbf16>
    %cst = arith.constant dense<0.000000e+00> : vector<16x96xf32>
    %3 = tpu.matmul %1, %2, %cst {dimension_numbers = #tpu.dot_dimension_numbers<[1], [0], [0], [1], [0, 0, 1, 1], [], []>} : vector<16x32xbf16>, vector<32x96xbf16>, vector<16x96xf32> -> vector<16x96xf32>
    %c0_3 = arith.constant 0 : index
    %c0_4 = arith.constant 0 : index
    %4 = vector.load %arg4[%c0_3, %c0_4] : memref<1x96xf32, #tpu.memory_space<vmem>>, vector<1x96xf32>
    %5 = vector.broadcast %4 : vector<1x96xf32> to vector<16x96xf32>
    %6 = arith.addf %3, %5 : vector<16x96xf32>
    %7 = arith.truncf %6 : vector<16x96xf32> to vector<16x96xbf16>
    %c0_5 = arith.constant 0 : index
    %c0_6 = arith.constant 0 : index
    %8 = vector.load %arg5[%c0_5, %c0_6] : memref<16x96xbf16, #tpu.memory_space<vmem>>, vector<16x96xbf16>
    tpu.vector_store %arg5[%c0_5, %c0_6], %7 {strides = array<i32>} : memref<16x96xbf16, #tpu.memory_space<vmem>>, vector<16x96xbf16>,
    return
  }
  func.func @transform_0(%arg0: i32, %arg1: i32) -> (i32, i32) {
    %c0_i32 = arith.constant 0 : i32
    %c0_i32_0 = arith.constant 0 : i32
    return %arg0, %c0_i32 : i32, i32
  }
  func.func @transform_1(%arg0: i32, %arg1: i32) -> (i32, i32) {
    %c0_i32 = arith.constant 0 : i32
    %c0_i32_0 = arith.constant 0 : i32
    return %c0_i32, %arg1 : i32, i32
  }
  func.func @transform_2(%arg0: i32, %arg1: i32) -> (i32, i32) {
    %c0_i32 = arith.constant 0 : i32
    %c0_i32_0 = arith.constant 0 : i32
    return %c0_i32, %arg1 : i32, i32
  }
  func.func @transform_3(%arg0: i32, %arg1: i32) -> (i32, i32) {
    %c0_i32 = arith.constant 0 : i32
    return %arg0, %arg1 : i32, i32
  }
}

module attributes {stable_mosaic.version = 11 : i64} {
  func.func @_attn_kernel(%arg0: i32, %arg1: i32, %arg2: memref<1x8x1xf32, #tpu.memory_space<vmem>>, %arg3: memref<1x1x8xf32, #tpu.memory_space<vmem>>, %arg4: memref<1x8x32xbf16, #tpu.memory_space<vmem>>, %arg5: memref<1x8x32xbf16, #tpu.memory_space<vmem>>, %arg6: memref<1x8x32xbf16, #tpu.memory_space<vmem>>, %arg7: memref<1x8x32xbf16, #tpu.memory_space<vmem>>) attributes {dimension_semantics = [#tpu.dimension_semantics<parallel>, #tpu.dimension_semantics<parallel>], iteration_bounds = array<i64: 2, 1>, scalar_prefetch = 0 : i64, scratch_operands = 0 : i64, tpu.core_type = #tpu.core_type<tc>, window_params = [{transform_indices = @transform_0, window_bounds = array<i64: 1, 8, 1>}, {transform_indices = @transform_1, window_bounds = array<i64: 1, 1, 8>}, {transform_indices = @transform_2, window_bounds = array<i64: 1, 8, 32>}, {transform_indices = @transform_3, window_bounds = array<i64: 1, 8, 32>}, {transform_indices = @transform_4, window_bounds = array<i64: 1, 8, 32>}, {transform_indices = @transform_5, window_bounds = array<i64: 1, 8, 32>}]} {
    %c0 = arith.constant 0 : index
    %c0_0 = arith.constant 0 : index
    %c0_1 = arith.constant 0 : index
    %0 = vector.load %arg2[%c0, %c0_0, %c0_1] : memref<1x8x1xf32, #tpu.memory_space<vmem>>, vector<1x8x1xf32>
    %1 = vector.shape_cast %0 : vector<1x8x1xf32> to vector<8x1xf32>
    %c0_2 = arith.constant 0 : index
    %c0_3 = arith.constant 0 : index
    %c0_4 = arith.constant 0 : index
    %2 = vector.load %arg3[%c0_2, %c0_3, %c0_4] : memref<1x1x8xf32, #tpu.memory_space<vmem>>, vector<1x1x8xf32>
    %3 = vector.shape_cast %2 : vector<1x1x8xf32> to vector<1x8xf32>
    %4 = vector.broadcast %1 : vector<8x1xf32> to vector<8x8xf32>
    %5 = vector.broadcast %3 : vector<1x8xf32> to vector<8x8xf32>
    %6 = arith.mulf %4, %5 : vector<8x8xf32>
    %cst = arith.constant dense<0.000000e+00> : vector<8xf32>
    %7 = vector.multi_reduction <add>, %6, %cst [1] : vector<8x8xf32> to vector<8xf32>
    %8 = vector.shape_cast %7 : vector<8xf32> to vector<8x1xf32>
    %cst_5 = arith.constant 0.000000e+00 : f32
    %9 = vector.broadcast %cst_5 : f32 to vector<8x1xf32>
    %10 = arith.cmpf oeq, %8, %9 : vector<8x1xf32>
    %cst_6 = arith.constant 1.000000e+00 : f32
    %11 = vector.shape_cast %10 : vector<8x1xi1> to vector<8x1xi1>
    %12 = vector.broadcast %11 : vector<8x1xi1> to vector<8x8xi1>
    %13 = vector.broadcast %cst_6 : f32 to vector<8x8xf32>
    %14 = arith.select %12, %13, %6 : vector<8x8xi1>, vector<8x8xf32>
    %cst_7 = arith.constant 0.000000e+00 : f32
    %15 = vector.broadcast %cst_7 : f32 to vector<8x8xf32>
    %16 = arith.cmpf oeq, %14, %15 : vector<8x8xf32>
    %cst_8 = arith.constant 0xFF800000 : f32
    %cst_9 = arith.constant 0.000000e+00 : f32
    %17 = vector.broadcast %cst_8 : f32 to vector<8x8xf32>
    %18 = vector.broadcast %cst_9 : f32 to vector<8x8xf32>
    %19 = arith.select %16, %17, %18 : vector<8x8xi1>, vector<8x8xf32>
    %c0_10 = arith.constant 0 : index
    %c0_11 = arith.constant 0 : index
    %c0_12 = arith.constant 0 : index
    %20 = vector.load %arg4[%c0_10, %c0_11, %c0_12] : memref<1x8x32xbf16, #tpu.memory_space<vmem>>, vector<1x8x32xbf16>
    %21 = vector.shape_cast %20 : vector<1x8x32xbf16> to vector<8x32xbf16>
    %cst_13 = arith.constant 2.500000e-01 : bf16
    %22 = vector.broadcast %cst_13 : bf16 to vector<8x32xbf16>
    %23 = arith.mulf %21, %22 : vector<8x32xbf16>
    %c0_14 = arith.constant 0 : index
    %c0_15 = arith.constant 0 : index
    %c0_16 = arith.constant 0 : index
    %24 = vector.load %arg5[%c0_14, %c0_15, %c0_16] : memref<1x8x32xbf16, #tpu.memory_space<vmem>>, vector<1x8x32xbf16>
    %25 = vector.shape_cast %24 : vector<1x8x32xbf16> to vector<8x32xbf16>
    %c0_17 = arith.constant 0 : index
    %c0_18 = arith.constant 0 : index
    %c0_19 = arith.constant 0 : index
    %26 = vector.load %arg6[%c0_17, %c0_18, %c0_19] : memref<1x8x32xbf16, #tpu.memory_space<vmem>>, vector<1x8x32xbf16>
    %27 = vector.shape_cast %26 : vector<1x8x32xbf16> to vector<8x32xbf16>
    %28 = vector.extract_strided_slice %23 {offsets = [0, 0], sizes = [8, 16], strides = [1, 1]} : vector<8x32xbf16> to vector<8x16xbf16>
    %29 = vector.extract_strided_slice %25 {offsets = [0, 0], sizes = [8, 16], strides = [1, 1]} : vector<8x32xbf16> to vector<8x16xbf16>
    %30 = vector.extract_strided_slice %27 {offsets = [0, 0], sizes = [8, 16], strides = [1, 1]} : vector<8x32xbf16> to vector<8x16xbf16>
    %cst_20 = arith.constant dense<0.000000e+00> : vector<8x8xf32>
    %31 = tpu.matmul %28, %29, %cst_20 {dimension_numbers = #tpu.dot_dimension_numbers<[1], [1], [0], [0], [0, 0, 1, 0], [], []>} : vector<8x16xbf16>, vector<8x16xbf16>, vector<8x8xf32> -> vector<8x8xf32>
    %32 = arith.addf %31, %19 : vector<8x8xf32>
    %cst_21 = arith.constant dense<0xFF800000> : vector<8xf32>
    %33 = vector.multi_reduction <maximumf>, %32, %cst_21 [1] : vector<8x8xf32> to vector<8xf32>
    %34 = vector.shape_cast %33 : vector<8xf32> to vector<8x1xf32>
    %35 = vector.broadcast %34 : vector<8x1xf32> to vector<8x8xf32>
    %36 = arith.subf %32, %35 : vector<8x8xf32>
    %37 = math.exp %36 : vector<8x8xf32>
    %cst_22 = arith.constant dense<0.000000e+00> : vector<8xf32>
    %38 = vector.multi_reduction <add>, %37, %cst_22 [1] : vector<8x8xf32> to vector<8xf32>
    %39 = vector.shape_cast %38 : vector<8xf32> to vector<8x1xf32>
    %40 = arith.truncf %37 : vector<8x8xf32> to vector<8x8xbf16>
    %cst_23 = arith.constant dense<0.000000e+00> : vector<8x16xf32>
    %41 = tpu.matmul %40, %30, %cst_23 {dimension_numbers = #tpu.dot_dimension_numbers<[1], [0], [0], [1], [0, 0, 1, 1], [], []>} : vector<8x8xbf16>, vector<8x16xbf16>, vector<8x16xf32> -> vector<8x16xf32>
    %42 = tpu.reciprocal %39 {approx = true} : vector<8x1xf32> -> vector<8x1xf32>
    %43 = vector.broadcast %42 : vector<8x1xf32> to vector<8x16xf32>
    %44 = arith.mulf %41, %43 : vector<8x16xf32>
    %45 = vector.extract_strided_slice %23 {offsets = [0, 16], sizes = [8, 16], strides = [1, 1]} : vector<8x32xbf16> to vector<8x16xbf16>
    %46 = vector.extract_strided_slice %25 {offsets = [0, 16], sizes = [8, 16], strides = [1, 1]} : vector<8x32xbf16> to vector<8x16xbf16>
    %47 = vector.extract_strided_slice %27 {offsets = [0, 16], sizes = [8, 16], strides = [1, 1]} : vector<8x32xbf16> to vector<8x16xbf16>
    %cst_24 = arith.constant dense<0.000000e+00> : vector<8x8xf32>
    %48 = tpu.matmul %45, %46, %cst_24 {dimension_numbers = #tpu.dot_dimension_numbers<[1], [1], [0], [0], [0, 0, 1, 0], [], []>} : vector<8x16xbf16>, vector<8x16xbf16>, vector<8x8xf32> -> vector<8x8xf32>
    %49 = arith.addf %48, %19 : vector<8x8xf32>
    %cst_25 = arith.constant dense<0xFF800000> : vector<8xf32>
    %50 = vector.multi_reduction <maximumf>, %49, %cst_25 [1] : vector<8x8xf32> to vector<8xf32>
    %51 = vector.shape_cast %50 : vector<8xf32> to vector<8x1xf32>
    %52 = vector.broadcast %51 : vector<8x1xf32> to vector<8x8xf32>
    %53 = arith.subf %49, %52 : vector<8x8xf32>
    %54 = math.exp %53 : vector<8x8xf32>
    %cst_26 = arith.constant dense<0.000000e+00> : vector<8xf32>
    %55 = vector.multi_reduction <add>, %54, %cst_26 [1] : vector<8x8xf32> to vector<8xf32>
    %56 = vector.shape_cast %55 : vector<8xf32> to vector<8x1xf32>
    %57 = arith.truncf %54 : vector<8x8xf32> to vector<8x8xbf16>
    %cst_27 = arith.constant dense<0.000000e+00> : vector<8x16xf32>
    %58 = tpu.matmul %57, %47, %cst_27 {dimension_numbers = #tpu.dot_dimension_numbers<[1], [0], [0], [1], [0, 0, 1, 1], [], []>} : vector<8x8xbf16>, vector<8x16xbf16>, vector<8x16xf32> -> vector<8x16xf32>
    %59 = tpu.reciprocal %56 {approx = true} : vector<8x1xf32> -> vector<8x1xf32>
    %60 = vector.broadcast %59 : vector<8x1xf32> to vector<8x16xf32>
    %61 = arith.mulf %58, %60 : vector<8x16xf32>
    %62 = tpu.concatenate %44, %61 in 1 : vector<8x16xf32>, vector<8x16xf32> -> vector<8x32xf32>
    %63 = arith.truncf %62 : vector<8x32xf32> to vector<8x32xbf16>
    %c0_28 = arith.constant 0 : index
    %c0_29 = arith.constant 0 : index
    %c0_30 = arith.constant 0 : index
    %64 = vector.load %arg7[%c0_28, %c0_29, %c0_30] : memref<1x8x32xbf16, #tpu.memory_space<vmem>>, vector<1x8x32xbf16>
    %65 = vector.shape_cast %64 : vector<1x8x32xbf16> to vector<8x32xbf16>
    %66 = vector.shape_cast %63 : vector<8x32xbf16> to vector<1x8x32xbf16>
    tpu.vector_store %arg7[%c0_28, %c0_29, %c0_30], %66 {strides = array<i32>} : memref<1x8x32xbf16, #tpu.memory_space<vmem>>, vector<1x8x32xbf16>,
    return
  }
  func.func @transform_0(%arg0: i32, %arg1: i32) -> (i32, i32, i32) {
    %c0_i32 = arith.constant 0 : i32
    %c0_i32_0 = arith.constant 0 : i32
    return %arg0, %arg1, %c0_i32 : i32, i32, i32
  }
  func.func @transform_1(%arg0: i32, %arg1: i32) -> (i32, i32, i32) {
    %c0_i32 = arith.constant 0 : i32
    %c0_i32_0 = arith.constant 0 : i32
    %c0_i32_1 = arith.constant 0 : i32
    return %arg0, %c0_i32, %c0_i32_0 : i32, i32, i32
  }
  func.func @transform_2(%arg0: i32, %arg1: i32) -> (i32, i32, i32) {
    %c0_i32 = arith.constant 0 : i32
    %c0_i32_0 = arith.constant 0 : i32
    return %arg0, %arg1, %c0_i32 : i32, i32, i32
  }
  func.func @transform_3(%arg0: i32, %arg1: i32) -> (i32, i32, i32) {
    %c0_i32 = arith.constant 0 : i32
    %c0_i32_0 = arith.constant 0 : i32
    %c0_i32_1 = arith.constant 0 : i32
    return %arg0, %c0_i32, %c0_i32_0 : i32, i32, i32
  }
  func.func @transform_4(%arg0: i32, %arg1: i32) -> (i32, i32, i32) {
    %c0_i32 = arith.constant 0 : i32
    %c0_i32_0 = arith.constant 0 : i32
    %c0_i32_1 = arith.constant 0 : i32
    return %arg0, %c0_i32, %c0_i32_0 : i32, i32, i32
  }
  func.func @transform_5(%arg0: i32, %arg1: i32) -> (i32, i32, i32) {
    %c0_i32 = arith.constant 0 : i32
    %c0_i32_0 = arith.constant 0 : i32
    return %arg0, %arg1, %c0_i32 : i32, i32, i32
  }
}

module attributes {stable_mosaic.version = 11 : i64} {
  func.func @_linear_add_ln_kernel(%arg0: i32, %arg1: memref<16x32xbf16, #tpu.memory_space<vmem>>, %arg2: memref<32x32xbf16, #tpu.memory_space<vmem>>, %arg3: memref<1x32xf32, #tpu.memory_space<vmem>>, %arg4: memref<16x32xf32, #tpu.memory_space<vmem>>, %arg5: memref<1x32xf32, #tpu.memory_space<vmem>>, %arg6: memref<1x32xf32, #tpu.memory_space<vmem>>, %arg7: memref<16x32xf32, #tpu.memory_space<vmem>>) attributes {dimension_semantics = [#tpu.dimension_semantics<parallel>], iteration_bounds = array<i64: 1>, scalar_prefetch = 0 : i64, scratch_operands = 0 : i64, tpu.core_type = #tpu.core_type<tc>, window_params = [{transform_indices = @transform_0, window_bounds = array<i64: 16, 32>}, {pipeline_mode = #tpu.pipeline_mode<synchronous>, transform_indices = @transform_1, window_bounds = array<i64: 32, 32>}, {pipeline_mode = #tpu.pipeline_mode<synchronous>, transform_indices = @transform_2, window_bounds = array<i64: 1, 32>}, {transform_indices = @transform_3, window_bounds = array<i64: 16, 32>}, {pipeline_mode = #tpu.pipeline_mode<synchronous>, transform_indices = @transform_4, window_bounds = array<i64: 1, 32>}, {pipeline_mode = #tpu.pipeline_mode<synchronous>, transform_indices = @transform_5, window_bounds = array<i64: 1, 32>}, {transform_indices = @transform_6, window_bounds = array<i64: 16, 32>}]} {
    %c0 = arith.constant 0 : index
    %c0_0 = arith.constant 0 : index
    %0 = vector.load %arg1[%c0, %c0_0] : memref<16x32xbf16, #tpu.memory_space<vmem>>, vector<16x32xbf16>
    %c0_1 = arith.constant 0 : index
    %c0_2 = arith.constant 0 : index
    %1 = vector.load %arg2[%c0_1, %c0_2] : memref<32x32xbf16, #tpu.memory_space<vmem>>, vector<32x32xbf16>
    %cst = arith.constant dense<0.000000e+00> : vector<16x32xf32>
    %2 = tpu.matmul %0, %1, %cst {dimension_numbers = #tpu.dot_dimension_numbers<[1], [0], [0], [1], [0, 0, 1, 1], [], []>} : vector<16x32xbf16>, vector<32x32xbf16>, vector<16x32xf32> -> vector<16x32xf32>
    %c0_3 = arith.constant 0 : index
    %c0_4 = arith.constant 0 : index
    %3 = vector.load %arg3[%c0_3, %c0_4] : memref<1x32xf32, #tpu.memory_space<vmem>>, vector<1x32xf32>
    %4 = vector.broadcast %3 : vector<1x32xf32> to vector<16x32xf32>
    %5 = arith.addf %2, %4 : vector<16x32xf32>
    %c0_5 = arith.constant 0 : index
    %c0_6 = arith.constant 0 : index
    %6 = vector.load %arg4[%c0_5, %c0_6] : memref<16x32xf32, #tpu.memory_space<vmem>>, vector<16x32xf32>
    %7 = arith.addf %5, %6 : vector<16x32xf32>
    %cst_7 = arith.constant dense<0.000000e+00> : vector<16xf32>
    %8 = vector.multi_reduction <add>, %7, %cst_7 [1] : vector<16x32xf32> to vector<16xf32>
    %9 = vector.shape_cast %8 : vector<16xf32> to vector<16x1xf32>
    %cst_8 = arith.constant 3.200000e+01 : f32
    %10 = vector.broadcast %cst_8 : f32 to vector<16x1xf32>
    %11 = arith.divf %9, %10 : vector<16x1xf32>
    %12 = vector.broadcast %11 : vector<16x1xf32> to vector<16x32xf32>
    %13 = arith.subf %7, %12 : vector<16x32xf32>
    %14 = arith.mulf %13, %13 : vector<16x32xf32>
    %cst_9 = arith.constant dense<0.000000e+00> : vector<16xf32>
    %15 = vector.multi_reduction <add>, %14, %cst_9 [1] : vector<16x32xf32> to vector<16xf32>
    %16 = vector.shape_cast %15 : vector<16xf32> to vector<16x1xf32>
    %cst_10 = arith.constant 3.200000e+01 : f32
    %17 = vector.broadcast %cst_10 : f32 to vector<16x1xf32>
    %18 = arith.divf %16, %17 : vector<16x1xf32>
    %19 = vector.broadcast %11 : vector<16x1xf32> to vector<16x32xf32>
    %20 = arith.subf %7, %19 : vector<16x32xf32>
    %cst_11 = arith.constant 9.99999974E-6 : f32
    %21 = vector.broadcast %cst_11 : f32 to vector<16x1xf32>
    %22 = arith.addf %18, %21 : vector<16x1xf32>
    %23 = math.rsqrt %22 : vector<16x1xf32>
    %24 = vector.broadcast %23 : vector<16x1xf32> to vector<16x32xf32>
    %25 = arith.mulf %20, %24 : vector<16x32xf32>
    %c0_12 = arith.constant 0 : index
    %c0_13 = arith.constant 0 : index
    %26 = vector.load %arg5[%c0_12, %c0_13] : memref<1x32xf32, #tpu.memory_space<vmem>>, vector<1x32xf32>
    %27 = vector.broadcast %26 : vector<1x32xf32> to vector<16x32xf32>
    %28 = arith.mulf %25, %27 : vector<16x32xf32>
    %c0_14 = arith.constant 0 : index
    %c0_15 = arith.constant 0 : index
    %29 = vector.load %arg6[%c0_14, %c0_15] : memref<1x32xf32, #tpu.memory_space<vmem>>, vector<1x32xf32>
    %30 = vector.broadcast %29 : vector<1x32xf32> to vector<16x32xf32>
    %31 = arith.addf %28, %30 : vector<16x32xf32>
    %c0_16 = arith.constant 0 : index
    %c0_17 = arith.constant 0 : index
    %32 = vector.load %arg7[%c0_16, %c0_17] : memref<16x32xf32, #tpu.memory_space<vmem>>, vector<16x32xf32>
    tpu.vector_store %arg7[%c0_16, %c0_17], %31 {strides = array<i32>} : memref<16x32xf32, #tpu.memory_space<vmem>>, vector<16x32xf32>,
    return
  }
  func.func @transform_0(%arg0: i32) -> (i32, i32) {
    %c0_i32 = arith.constant 0 : i32
    %c0_i32_0 = arith.constant 0 : i32
    return %arg0, %c0_i32 : i32, i32
  }
  func.func @transform_1(%arg0: i32) -> (i32, i32) {
    %c0_i32 = arith.constant 0 : i32
    %c0_i32_0 = arith.constant 0 : i32
    %c0_i32_1 = arith.constant 0 : i32
    return %c0_i32, %c0_i32_0 : i32, i32
  }
  func.func @transform_2(%arg0: i32) -> (i32, i32) {
    %c0_i32 = arith.constant 0 : i32
    %c0_i32_0 = arith.constant 0 : i32
    %c0_i32_1 = arith.constant 0 : i32
    return %c0_i32, %c0_i32_0 : i32, i32
  }
  func.func @transform_3(%arg0: i32) -> (i32, i32) {
    %c0_i32 = arith.constant 0 : i32
    %c0_i32_0 = arith.constant 0 : i32
    return %arg0, %c0_i32 : i32, i32
  }
  func.func @transform_4(%arg0: i32) -> (i32, i32) {
    %c0_i32 = arith.constant 0 : i32
    %c0_i32_0 = arith.constant 0 : i32
    %c0_i32_1 = arith.constant 0 : i32
    return %c0_i32, %c0_i32_0 : i32, i32
  }
  func.func @transform_5(%arg0: i32) -> (i32, i32) {
    %c0_i32 = arith.constant 0 : i32
    %c0_i32_0 = arith.constant 0 : i32
    %c0_i32_1 = arith.constant 0 : i32
    return %c0_i32, %c0_i32_0 : i32, i32
  }
  func.func @transform_6(%arg0: i32) -> (i32, i32) {
    %c0_i32 = arith.constant 0 : i32
    %c0_i32_0 = arith.constant 0 : i32
    return %arg0, %c0_i32 : i32, i32
  }
}

module attributes {stable_mosaic.version = 11 : i64} {
  func.func @_ffn_add_ln_kernel(%arg0: i32, %arg1: i32, %arg2: memref<16x32xf32, #tpu.memory_space<vmem>>, %arg3: memref<32x64xbf16, #tpu.memory_space<vmem>>, %arg4: memref<1x64xf32, #tpu.memory_space<vmem>>, %arg5: memref<64x32xbf16, #tpu.memory_space<vmem>>, %arg6: memref<1x32xf32, #tpu.memory_space<vmem>>, %arg7: memref<1x32xf32, #tpu.memory_space<vmem>>, %arg8: memref<1x32xf32, #tpu.memory_space<vmem>>, %arg9: memref<16x32xf32, #tpu.memory_space<vmem>>, %arg10: memref<16x32xf32, #tpu.memory_space<vmem>>) attributes {dimension_semantics = [#tpu.dimension_semantics<parallel>, #tpu.dimension_semantics<arbitrary>], iteration_bounds = array<i64: 1, 1>, scalar_prefetch = 0 : i64, scratch_operands = 1 : i64, tpu.core_type = #tpu.core_type<tc>, window_params = [{transform_indices = @transform_0, window_bounds = array<i64: 16, 32>}, {transform_indices = @transform_1, window_bounds = array<i64: 32, 64>}, {transform_indices = @transform_2, window_bounds = array<i64: 1, 64>}, {transform_indices = @transform_3, window_bounds = array<i64: 64, 32>}, {pipeline_mode = #tpu.pipeline_mode<synchronous>, transform_indices = @transform_4, window_bounds = array<i64: 1, 32>}, {pipeline_mode = #tpu.pipeline_mode<synchronous>, transform_indices = @transform_5, window_bounds = array<i64: 1, 32>}, {pipeline_mode = #tpu.pipeline_mode<synchronous>, transform_indices = @transform_6, window_bounds = array<i64: 1, 32>}, {transform_indices = @transform_7, window_bounds = array<i64: 16, 32>}]} {
    %c0_i32 = arith.constant 0 : i32
    %0 = arith.cmpi eq, %arg1, %c0_i32 : i32
    %1 = arith.extui %0 : i1 to i32
    %c0_i32_0 = arith.constant 0 : i32
    %2 = arith.cmpi ne, %1, %c0_i32_0 : i32
    scf.if %2 {
      %cst_16 = arith.constant 0.000000e+00 : f32
      %21 = vector.broadcast %cst_16 : f32 to vector<16x32xf32>
      %c0_17 = arith.constant 0 : index
      %c0_18 = arith.constant 0 : index
      %22 = vector.load %arg10[%c0_17, %c0_18] : memref<16x32xf32, #tpu.memory_space<vmem>>, vector<16x32xf32>
      tpu.vector_store %arg10[%c0_17, %c0_18], %21 {strides = array<i32>} : memref<16x32xf32, #tpu.memory_space<vmem>>, vector<16x32xf32>,
    } else {
    }
    %c0 = arith.constant 0 : index
    %c0_1 = arith.constant 0 : index
    %3 = vector.load %arg2[%c0, %c0_1] : memref<16x32xf32, #tpu.memory_space<vmem>>, vector<16x32xf32>
    %4 = arith.truncf %3 : vector<16x32xf32> to vector<16x32xbf16>
    %c0_2 = arith.constant 0 : index
    %c0_3 = arith.constant 0 : index
    %5 = vector.load %arg3[%c0_2, %c0_3] : memref<32x64xbf16, #tpu.memory_space<vmem>>, vector<32x64xbf16>
    %cst = arith.constant dense<0.000000e+00> : vector<16x64xf32>
    %6 = tpu.matmul %4, %5, %cst {dimension_numbers = #tpu.dot_dimension_numbers<[1], [0], [0], [1], [0, 0, 1, 1], [], []>} : vector<16x32xbf16>, vector<32x64xbf16>, vector<16x64xf32> -> vector<16x64xf32>
    %c0_4 = arith.constant 0 : index
    %c0_5 = arith.constant 0 : index
    %7 = vector.load %arg4[%c0_4, %c0_5] : memref<1x64xf32, #tpu.memory_space<vmem>>, vector<1x64xf32>
    %8 = vector.broadcast %7 : vector<1x64xf32> to vector<16x64xf32>
    %9 = arith.addf %6, %8 : vector<16x64xf32>
    %cst_6 = arith.constant 0.000000e+00 : f32
    %10 = vector.broadcast %cst_6 : f32 to vector<16x64xf32>
    %11 = arith.maximumf %9, %10 : vector<16x64xf32>
    %12 = arith.truncf %11 : vector<16x64xf32> to vector<16x64xbf16>
    %c0_7 = arith.constant 0 : index
    %c0_8 = arith.constant 0 : index
    %13 = vector.load %arg10[%c0_7, %c0_8] : memref<16x32xf32, #tpu.memory_space<vmem>>, vector<16x32xf32>
    %c0_9 = arith.constant 0 : index
    %c0_10 = arith.constant 0 : index
    %14 = vector.load %arg5[%c0_9, %c0_10] : memref<64x32xbf16, #tpu.memory_space<vmem>>, vector<64x32xbf16>
    %cst_11 = arith.constant dense<0.000000e+00> : vector<16x32xf32>
    %15 = tpu.matmul %12, %14, %cst_11 {dimension_numbers = #tpu.dot_dimension_numbers<[1], [0], [0], [1], [0, 0, 1, 1], [], []>} : vector<16x64xbf16>, vector<64x32xbf16>, vector<16x32xf32> -> vector<16x32xf32>
    %16 = arith.addf %13, %15 : vector<16x32xf32>
    %c0_12 = arith.constant 0 : index
    %c0_13 = arith.constant 0 : index
    %17 = vector.load %arg10[%c0_12, %c0_13] : memref<16x32xf32, #tpu.memory_space<vmem>>, vector<16x32xf32>
    tpu.vector_store %arg10[%c0_12, %c0_13], %16 {strides = array<i32>} : memref<16x32xf32, #tpu.memory_space<vmem>>, vector<16x32xf32>,
    %c0_i32_14 = arith.constant 0 : i32
    %18 = arith.cmpi eq, %arg1, %c0_i32_14 : i32
    %19 = arith.extui %18 : i1 to i32
    %c0_i32_15 = arith.constant 0 : i32
    %20 = arith.cmpi ne, %19, %c0_i32_15 : i32
    scf.if %20 {
      %c0_16 = arith.constant 0 : index
      %c0_17 = arith.constant 0 : index
      %21 = vector.load %arg10[%c0_16, %c0_17] : memref<16x32xf32, #tpu.memory_space<vmem>>, vector<16x32xf32>
      %c0_18 = arith.constant 0 : index
      %c0_19 = arith.constant 0 : index
      %22 = vector.load %arg6[%c0_18, %c0_19] : memref<1x32xf32, #tpu.memory_space<vmem>>, vector<1x32xf32>
      %23 = vector.broadcast %22 : vector<1x32xf32> to vector<16x32xf32>
      %24 = arith.addf %21, %23 : vector<16x32xf32>
      %c0_20 = arith.constant 0 : index
      %c0_21 = arith.constant 0 : index
      %25 = vector.load %arg2[%c0_20, %c0_21] : memref<16x32xf32, #tpu.memory_space<vmem>>, vector<16x32xf32>
      %26 = arith.addf %24, %25 : vector<16x32xf32>
      %cst_22 = arith.constant dense<0.000000e+00> : vector<16xf32>
      %27 = vector.multi_reduction <add>, %26, %cst_22 [1] : vector<16x32xf32> to vector<16xf32>
      %28 = vector.shape_cast %27 : vector<16xf32> to vector<16x1xf32>
      %cst_23 = arith.constant 3.200000e+01 : f32
      %29 = vector.broadcast %cst_23 : f32 to vector<16x1xf32>
      %30 = arith.divf %28, %29 : vector<16x1xf32>
      %31 = vector.broadcast %30 : vector<16x1xf32> to vector<16x32xf32>
      %32 = arith.subf %26, %31 : vector<16x32xf32>
      %33 = arith.mulf %32, %32 : vector<16x32xf32>
      %cst_24 = arith.constant dense<0.000000e+00> : vector<16xf32>
      %34 = vector.multi_reduction <add>, %33, %cst_24 [1] : vector<16x32xf32> to vector<16xf32>
      %35 = vector.shape_cast %34 : vector<16xf32> to vector<16x1xf32>
      %cst_25 = arith.constant 3.200000e+01 : f32
      %36 = vector.broadcast %cst_25 : f32 to vector<16x1xf32>
      %37 = arith.divf %35, %36 : vector<16x1xf32>
      %38 = vector.broadcast %30 : vector<16x1xf32> to vector<16x32xf32>
      %39 = arith.subf %26, %38 : vector<16x32xf32>
      %cst_26 = arith.constant 9.99999974E-6 : f32
      %40 = vector.broadcast %cst_26 : f32 to vector<16x1xf32>
      %41 = arith.addf %37, %40 : vector<16x1xf32>
      %42 = math.rsqrt %41 : vector<16x1xf32>
      %43 = vector.broadcast %42 : vector<16x1xf32> to vector<16x32xf32>
      %44 = arith.mulf %39, %43 : vector<16x32xf32>
      %c0_27 = arith.constant 0 : index
      %c0_28 = arith.constant 0 : index
      %45 = vector.load %arg7[%c0_27, %c0_28] : memref<1x32xf32, #tpu.memory_space<vmem>>, vector<1x32xf32>
      %46 = vector.broadcast %45 : vector<1x32xf32> to vector<16x32xf32>
      %47 = arith.mulf %44, %46 : vector<16x32xf32>
      %c0_29 = arith.constant 0 : index
      %c0_30 = arith.constant 0 : index
      %48 = vector.load %arg8[%c0_29, %c0_30] : memref<1x32xf32, #tpu.memory_space<vmem>>, vector<1x32xf32>
      %49 = vector.broadcast %48 : vector<1x32xf32> to vector<16x32xf32>
      %50 = arith.addf %47, %49 : vector<16x32xf32>
      %c0_31 = arith.constant 0 : index
      %c0_32 = arith.constant 0 : index
      %51 = vector.load %arg9[%c0_31, %c0_32] : memref<16x32xf32, #tpu.memory_space<vmem>>, vector<16x32xf32>
      tpu.vector_store %arg9[%c0_31, %c0_32], %50 {strides = array<i32>} : memref<16x32xf32, #tpu.memory_space<vmem>>, vector<16x32xf32>,
    } else {
    }
    return
  }
  func.func @transform_0(%arg0: i32, %arg1: i32) -> (i32, i32) {
    %c0_i32 = arith.constant 0 : i32
    %c0_i32_0 = arith.constant 0 : i32
    return %arg0, %c0_i32 : i32, i32
  }
  func.func @transform_1(%arg0: i32, %arg1: i32) -> (i32, i32) {
    %c0_i32 = arith.constant 0 : i32
    %c0_i32_0 = arith.constant 0 : i32
    return %c0_i32, %arg1 : i32, i32
  }
  func.func @transform_2(%arg0: i32, %arg1: i32) -> (i32, i32) {
    %c0_i32 = arith.constant 0 : i32
    %c0_i32_0 = arith.constant 0 : i32
    return %c0_i32, %arg1 : i32, i32
  }
  func.func @transform_3(%arg0: i32, %arg1: i32) -> (i32, i32) {
    %c0_i32 = arith.constant 0 : i32
    %c0_i32_0 = arith.constant 0 : i32
    return %arg1, %c0_i32 : i32, i32
  }
  func.func @transform_4(%arg0: i32, %arg1: i32) -> (i32, i32) {
    %c0_i32 = arith.constant 0 : i32
    %c0_i32_0 = arith.constant 0 : i32
    %c0_i32_1 = arith.constant 0 : i32
    return %c0_i32, %c0_i32_0 : i32, i32
  }
  func.func @transform_5(%arg0: i32, %arg1: i32) -> (i32, i32) {
    %c0_i32 = arith.constant 0 : i32
    %c0_i32_0 = arith.constant 0 : i32
    %c0_i32_1 = arith.constant 0 : i32
    return %c0_i32, %c0_i32_0 : i32, i32
  }
  func.func @transform_6(%arg0: i32, %arg1: i32) -> (i32, i32) {
    %c0_i32 = arith.constant 0 : i32
    %c0_i32_0 = arith.constant 0 : i32
    %c0_i32_1 = arith.constant 0 : i32
    return %c0_i32, %c0_i32_0 : i32, i32
  }
  func.func @transform_7(%arg0: i32, %arg1: i32) -> (i32, i32) {
    %c0_i32 = arith.constant 0 : i32
    %c0_i32_0 = arith.constant 0 : i32
    return %arg0, %c0_i32 : i32, i32
  }
}

module attributes {stable_mosaic.version = 11 : i64} {
  func.func @_linear_kernel(%arg0: i32, %arg1: i32, %arg2: memref<16x32xf32, #tpu.memory_space<vmem>>, %arg3: memref<32x64xbf16, #tpu.memory_space<vmem>>, %arg4: memref<1x64xf32, #tpu.memory_space<vmem>>, %arg5: memref<16x64xbf16, #tpu.memory_space<vmem>>) attributes {dimension_semantics = [#tpu.dimension_semantics<parallel>, #tpu.dimension_semantics<parallel>], iteration_bounds = array<i64: 1, 1>, scalar_prefetch = 0 : i64, scratch_operands = 0 : i64, tpu.core_type = #tpu.core_type<tc>, window_params = [{transform_indices = @transform_0, window_bounds = array<i64: 16, 32>}, {transform_indices = @transform_1, window_bounds = array<i64: 32, 64>}, {transform_indices = @transform_2, window_bounds = array<i64: 1, 64>}, {transform_indices = @transform_3, window_bounds = array<i64: 16, 64>}]} {
    %c0 = arith.constant 0 : index
    %c0_0 = arith.constant 0 : index
    %0 = vector.load %arg2[%c0, %c0_0] : memref<16x32xf32, #tpu.memory_space<vmem>>, vector<16x32xf32>
    %1 = arith.truncf %0 : vector<16x32xf32> to vector<16x32xbf16>
    %c0_1 = arith.constant 0 : index
    %c0_2 = arith.constant 0 : index
    %2 = vector.load %arg3[%c0_1, %c0_2] : memref<32x64xbf16, #tpu.memory_space<vmem>>, vector<32x64xbf16>
    %cst = arith.constant dense<0.000000e+00> : vector<16x64xf32>
    %3 = tpu.matmul %1, %2, %cst {dimension_numbers = #tpu.dot_dimension_numbers<[1], [0], [0], [1], [0, 0, 1, 1], [], []>} : vector<16x32xbf16>, vector<32x64xbf16>, vector<16x64xf32> -> vector<16x64xf32>
    %c0_3 = arith.constant 0 : index
    %c0_4 = arith.constant 0 : index
    %4 = vector.load %arg4[%c0_3, %c0_4] : memref<1x64xf32, #tpu.memory_space<vmem>>, vector<1x64xf32>
    %5 = vector.broadcast %4 : vector<1x64xf32> to vector<16x64xf32>
    %6 = arith.addf %3, %5 : vector<16x64xf32>
    %7 = arith.truncf %6 : vector<16x64xf32> to vector<16x64xbf16>
    %c0_5 = arith.constant 0 : index
    %c0_6 = arith.constant 0 : index
    %8 = vector.load %arg5[%c0_5, %c0_6] : memref<16x64xbf16, #tpu.memory_space<vmem>>, vector<16x64xbf16>
    tpu.vector_store %arg5[%c0_5, %c0_6], %7 {strides = array<i32>} : memref<16x64xbf16, #tpu.memory_space<vmem>>, vector<16x64xbf16>,
    return
  }
  func.func @transform_0(%arg0: i32, %arg1: i32) -> (i32, i32) {
    %c0_i32 = arith.constant 0 : i32
    %c0_i32_0 = arith.constant 0 : i32
    return %arg0, %c0_i32 : i32, i32
  }
  func.func @transform_1(%arg0: i32, %arg1: i32) -> (i32, i32) {
    %c0_i32 = arith.constant 0 : i32
    %c0_i32_0 = arith.constant 0 : i32
    return %c0_i32, %arg1 : i32, i32
  }
  func.func @transform_2(%arg0: i32, %arg1: i32) -> (i32, i32) {
    %c0_i32 = arith.constant 0 : i32
    %c0_i32_0 = arith.constant 0 : i32
    return %c0_i32, %arg1 : i32, i32
  }
  func.func @transform_3(%arg0: i32, %arg1: i32) -> (i32, i32) {
    %c0_i32 = arith.constant 0 : i32
    return %arg0, %arg1 : i32, i32
  }
}

module attributes {stable_mosaic.version = 11 : i64} {
  func.func @_attn_kernel(%arg0: i32, %arg1: i32, %arg2: memref<1x8x1xf32, #tpu.memory_space<vmem>>, %arg3: memref<1x1x8xf32, #tpu.memory_space<vmem>>, %arg4: memref<1x8x32xbf16, #tpu.memory_space<vmem>>, %arg5: memref<1x8x32xbf16, #tpu.memory_space<vmem>>, %arg6: memref<1x8x32xbf16, #tpu.memory_space<vmem>>, %arg7: memref<1x8x32xbf16, #tpu.memory_space<vmem>>) attributes {dimension_semantics = [#tpu.dimension_semantics<parallel>, #tpu.dimension_semantics<parallel>], iteration_bounds = array<i64: 2, 1>, scalar_prefetch = 0 : i64, scratch_operands = 0 : i64, tpu.core_type = #tpu.core_type<tc>, window_params = [{transform_indices = @transform_0, window_bounds = array<i64: 1, 8, 1>}, {transform_indices = @transform_1, window_bounds = array<i64: 1, 1, 8>}, {transform_indices = @transform_2, window_bounds = array<i64: 1, 8, 32>}, {transform_indices = @transform_3, window_bounds = array<i64: 1, 8, 32>}, {transform_indices = @transform_4, window_bounds = array<i64: 1, 8, 32>}, {transform_indices = @transform_5, window_bounds = array<i64: 1, 8, 32>}]} {
    %c0 = arith.constant 0 : index
    %c0_0 = arith.constant 0 : index
    %c0_1 = arith.constant 0 : index
    %0 = vector.load %arg2[%c0, %c0_0, %c0_1] : memref<1x8x1xf32, #tpu.memory_space<vmem>>, vector<1x8x1xf32>
    %1 = vector.shape_cast %0 : vector<1x8x1xf32> to vector<8x1xf32>
    %c0_2 = arith.constant 0 : index
    %c0_3 = arith.constant 0 : index
    %c0_4 = arith.constant 0 : index
    %2 = vector.load %arg3[%c0_2, %c0_3, %c0_4] : memref<1x1x8xf32, #tpu.memory_space<vmem>>, vector<1x1x8xf32>
    %3 = vector.shape_cast %2 : vector<1x1x8xf32> to vector<1x8xf32>
    %4 = vector.broadcast %1 : vector<8x1xf32> to vector<8x8xf32>
    %5 = vector.broadcast %3 : vector<1x8xf32> to vector<8x8xf32>
    %6 = arith.mulf %4, %5 : vector<8x8xf32>
    %cst = arith.constant dense<0.000000e+00> : vector<8xf32>
    %7 = vector.multi_reduction <add>, %6, %cst [1] : vector<8x8xf32> to vector<8xf32>
    %8 = vector.shape_cast %7 : vector<8xf32> to vector<8x1xf32>
    %cst_5 = arith.constant 0.000000e+00 : f32
    %9 = vector.broadcast %cst_5 : f32 to vector<8x1xf32>
    %10 = arith.cmpf oeq, %8, %9 : vector<8x1xf32>
    %cst_6 = arith.constant 1.000000e+00 : f32
    %11 = vector.shape_cast %10 : vector<8x1xi1> to vector<8x1xi1>
    %12 = vector.broadcast %11 : vector<8x1xi1> to vector<8x8xi1>
    %13 = vector.broadcast %cst_6 : f32 to vector<8x8xf32>
    %14 = arith.select %12, %13, %6 : vector<8x8xi1>, vector<8x8xf32>
    %cst_7 = arith.constant 0.000000e+00 : f32
    %15 = vector.broadcast %cst_7 : f32 to vector<8x8xf32>
    %16 = arith.cmpf oeq, %14, %15 : vector<8x8xf32>
    %cst_8 = arith.constant 0xFF800000 : f32
    %cst_9 = arith.constant 0.000000e+00 : f32
    %17 = vector.broadcast %cst_8 : f32 to vector<8x8xf32>
    %18 = vector.broadcast %cst_9 : f32 to vector<8x8xf32>
    %19 = arith.select %16, %17, %18 : vector<8x8xi1>, vector<8x8xf32>
    %20 = tpu.iota {dimensions = array<i32: 0>} : vector<8x8xi32>
    %c8_i32 = arith.constant 8 : i32
    %21 = arith.muli %arg1, %c8_i32 : i32
    %22 = vector.broadcast %21 : i32 to vector<8x8xi32>
    %23 = arith.addi %20, %22 : vector<8x8xi32>
    %24 = tpu.iota {dimensions = array<i32: 1>} : vector<8x8xi32>
    %25 = arith.cmpi sgt, %24, %23 : vector<8x8xi32>
    %cst_10 = arith.constant 0xFF800000 : f32
    %26 = vector.broadcast %cst_10 : f32 to vector<8x8xf32>
    %27 = arith.select %25, %26, %19 : vector<8x8xi1>, vector<8x8xf32>
    %c0_11 = arith.constant 0 : index
    %c0_12 = arith.constant 0 : index
    %c0_13 = arith.constant 0 : index
    %28 = vector.load %arg4[%c0_11, %c0_12, %c0_13] : memref<1x8x32xbf16, #tpu.memory_space<vmem>>, vector<1x8x32xbf16>
    %29 = vector.shape_cast %28 : vector<1x8x32xbf16> to vector<8x32xbf16>
    %cst_14 = arith.constant 2.500000e-01 : bf16
    %30 = vector.broadcast %cst_14 : bf16 to vector<8x32xbf16>
    %31 = arith.mulf %29, %30 : vector<8x32xbf16>
    %c0_15 = arith.constant 0 : index
    %c0_16 = arith.constant 0 : index
    %c0_17 = arith.constant 0 : index
    %32 = vector.load %arg5[%c0_15, %c0_16, %c0_17] : memref<1x8x32xbf16, #tpu.memory_space<vmem>>, vector<1x8x32xbf16>
    %33 = vector.shape_cast %32 : vector<1x8x32xbf16> to vector<8x32xbf16>
    %c0_18 = arith.constant 0 : index
    %c0_19 = arith.constant 0 : index
    %c0_20 = arith.constant 0 : index
    %34 = vector.load %arg6[%c0_18, %c0_19, %c0_20] : memref<1x8x32xbf16, #tpu.memory_space<vmem>>, vector<1x8x32xbf16>
    %35 = vector.shape_cast %34 : vector<1x8x32xbf16> to vector<8x32xbf16>
    %36 = vector.extract_strided_slice %31 {offsets = [0, 0], sizes = [8, 16], strides = [1, 1]} : vector<8x32xbf16> to vector<8x16xbf16>
    %37 = vector.extract_strided_slice %33 {offsets = [0, 0], sizes = [8, 16], strides = [1, 1]} : vector<8x32xbf16> to vector<8x16xbf16>
    %38 = vector.extract_strided_slice %35 {offsets = [0, 0], sizes = [8, 16], strides = [1, 1]} : vector<8x32xbf16> to vector<8x16xbf16>
    %cst_21 = arith.constant dense<0.000000e+00> : vector<8x8xf32>
    %39 = tpu.matmul %36, %37, %cst_21 {dimension_numbers = #tpu.dot_dimension_numbers<[1], [1], [0], [0], [0, 0, 1, 0], [], []>} : vector<8x16xbf16>, vector<8x16xbf16>, vector<8x8xf32> -> vector<8x8xf32>
    %40 = arith.addf %39, %27 : vector<8x8xf32>
    %cst_22 = arith.constant dense<0xFF800000> : vector<8xf32>
    %41 = vector.multi_reduction <maximumf>, %40, %cst_22 [1] : vector<8x8xf32> to vector<8xf32>
    %42 = vector.shape_cast %41 : vector<8xf32> to vector<8x1xf32>
    %43 = vector.broadcast %42 : vector<8x1xf32> to vector<8x8xf32>
    %44 = arith.subf %40, %43 : vector<8x8xf32>
    %45 = math.exp %44 : vector<8x8xf32>
    %cst_23 = arith.constant dense<0.000000e+00> : vector<8xf32>
    %46 = vector.multi_reduction <add>, %45, %cst_23 [1] : vector<8x8xf32> to vector<8xf32>
    %47 = vector.shape_cast %46 : vector<8xf32> to vector<8x1xf32>
    %48 = arith.truncf %45 : vector<8x8xf32> to vector<8x8xbf16>
    %cst_24 = arith.constant dense<0.000000e+00> : vector<8x16xf32>
    %49 = tpu.matmul %48, %38, %cst_24 {dimension_numbers = #tpu.dot_dimension_numbers<[1], [0], [0], [1], [0, 0, 1, 1], [], []>} : vector<8x8xbf16>, vector<8x16xbf16>, vector<8x16xf32> -> vector<8x16xf32>
    %50 = tpu.reciprocal %47 {approx = true} : vector<8x1xf32> -> vector<8x1xf32>
    %51 = vector.broadcast %50 : vector<8x1xf32> to vector<8x16xf32>
    %52 = arith.mulf %49, %51 : vector<8x16xf32>
    %53 = vector.extract_strided_slice %31 {offsets = [0, 16], sizes = [8, 16], strides = [1, 1]} : vector<8x32xbf16> to vector<8x16xbf16>
    %54 = vector.extract_strided_slice %33 {offsets = [0, 16], sizes = [8, 16], strides = [1, 1]} : vector<8x32xbf16> to vector<8x16xbf16>
    %55 = vector.extract_strided_slice %35 {offsets = [0, 16], sizes = [8, 16], strides = [1, 1]} : vector<8x32xbf16> to vector<8x16xbf16>
    %cst_25 = arith.constant dense<0.000000e+00> : vector<8x8xf32>
    %56 = tpu.matmul %53, %54, %cst_25 {dimension_numbers = #tpu.dot_dimension_numbers<[1], [1], [0], [0], [0, 0, 1, 0], [], []>} : vector<8x16xbf16>, vector<8x16xbf16>, vector<8x8xf32> -> vector<8x8xf32>
    %57 = arith.addf %56, %27 : vector<8x8xf32>
    %cst_26 = arith.constant dense<0xFF800000> : vector<8xf32>
    %58 = vector.multi_reduction <maximumf>, %57, %cst_26 [1] : vector<8x8xf32> to vector<8xf32>
    %59 = vector.shape_cast %58 : vector<8xf32> to vector<8x1xf32>
    %60 = vector.broadcast %59 : vector<8x1xf32> to vector<8x8xf32>
    %61 = arith.subf %57, %60 : vector<8x8xf32>
    %62 = math.exp %61 : vector<8x8xf32>
    %cst_27 = arith.constant dense<0.000000e+00> : vector<8xf32>
    %63 = vector.multi_reduction <add>, %62, %cst_27 [1] : vector<8x8xf32> to vector<8xf32>
    %64 = vector.shape_cast %63 : vector<8xf32> to vector<8x1xf32>
    %65 = arith.truncf %62 : vector<8x8xf32> to vector<8x8xbf16>
    %cst_28 = arith.constant dense<0.000000e+00> : vector<8x16xf32>
    %66 = tpu.matmul %65, %55, %cst_28 {dimension_numbers = #tpu.dot_dimension_numbers<[1], [0], [0], [1], [0, 0, 1, 1], [], []>} : vector<8x8xbf16>, vector<8x16xbf16>, vector<8x16xf32> -> vector<8x16xf32>
    %67 = tpu.reciprocal %64 {approx = true} : vector<8x1xf32> -> vector<8x1xf32>
    %68 = vector.broadcast %67 : vector<8x1xf32> to vector<8x16xf32>
    %69 = arith.mulf %66, %68 : vector<8x16xf32>
    %70 = tpu.concatenate %52, %69 in 1 : vector<8x16xf32>, vector<8x16xf32> -> vector<8x32xf32>
    %71 = arith.truncf %70 : vector<8x32xf32> to vector<8x32xbf16>
    %c0_29 = arith.constant 0 : index
    %c0_30 = arith.constant 0 : index
    %c0_31 = arith.constant 0 : index
    %72 = vector.load %arg7[%c0_29, %c0_30, %c0_31] : memref<1x8x32xbf16, #tpu.memory_space<vmem>>, vector<1x8x32xbf16>
    %73 = vector.shape_cast %72 : vector<1x8x32xbf16> to vector<8x32xbf16>
    %74 = vector.shape_cast %71 : vector<8x32xbf16> to vector<1x8x32xbf16>
    tpu.vector_store %arg7[%c0_29, %c0_30, %c0_31], %74 {strides = array<i32>} : memref<1x8x32xbf16, #tpu.memory_space<vmem>>, vector<1x8x32xbf16>,
    return
  }
  func.func @transform_0(%arg0: i32, %arg1: i32) -> (i32, i32, i32) {
    %c0_i32 = arith.constant 0 : i32
    %c0_i32_0 = arith.constant 0 : i32
    return %arg0, %arg1, %c0_i32 : i32, i32, i32
  }
  func.func @transform_1(%arg0: i32, %arg1: i32) -> (i32, i32, i32) {
    %c0_i32 = arith.constant 0 : i32
    %c0_i32_0 = arith.constant 0 : i32
    %c0_i32_1 = arith.constant 0 : i32
    return %arg0, %c0_i32, %c0_i32_0 : i32, i32, i32
  }
  func.func @transform_2(%arg0: i32, %arg1: i32) -> (i32, i32, i32) {
    %c0_i32 = arith.constant 0 : i32
    %c0_i32_0 = arith.constant 0 : i32
    return %arg0, %arg1, %c0_i32 : i32, i32, i32
  }
  func.func @transform_3(%arg0: i32, %arg1: i32) -> (i32, i32, i32) {
    %c0_i32 = arith.constant 0 : i32
    %c0_i32_0 = arith.constant 0 : i32
    %c0_i32_1 = arith.constant 0 : i32
    return %arg0, %c0_i32, %c0_i32_0 : i32, i32, i32
  }
  func.func @transform_4(%arg0: i32, %arg1: i32) -> (i32, i32, i32) {
    %c0_i32 = arith.constant 0 : i32
    %c0_i32_0 = arith.constant 0 : i32
    %c0_i32_1 = arith.constant 0 : i32
    return %arg0, %c0_i32, %c0_i32_0 : i32, i32, i32
  }
  func.func @transform_5(%arg0: i32, %arg1: i32) -> (i32, i32, i32) {
    %c0_i32 = arith.constant 0 : i32
    %c0_i32_0 = arith.constant 0 : i32
    return %arg0, %arg1, %c0_i32 : i32, i32, i32
  }
}

module attributes {stable_mosaic.version = 11 : i64} {
  func.func @_linear_kernel(%arg0: i32, %arg1: i32, %arg2: memref<16x32xf32, #tpu.memory_space<vmem>>, %arg3: memref<32x32xbf16, #tpu.memory_space<vmem>>, %arg4: memref<1x32xf32, #tpu.memory_space<vmem>>, %arg5: memref<16x32xbf16, #tpu.memory_space<vmem>>) attributes {dimension_semantics = [#tpu.dimension_semantics<parallel>, #tpu.dimension_semantics<parallel>], iteration_bounds = array<i64: 1, 1>, scalar_prefetch = 0 : i64, scratch_operands = 0 : i64, tpu.core_type = #tpu.core_type<tc>, window_params = [{transform_indices = @transform_0, window_bounds = array<i64: 16, 32>}, {transform_indices = @transform_1, window_bounds = array<i64: 32, 32>}, {transform_indices = @transform_2, window_bounds = array<i64: 1, 32>}, {transform_indices = @transform_3, window_bounds = array<i64: 16, 32>}]} {
    %c0 = arith.constant 0 : index
    %c0_0 = arith.constant 0 : index
    %0 = vector.load %arg2[%c0, %c0_0] : memref<16x32xf32, #tpu.memory_space<vmem>>, vector<16x32xf32>
    %1 = arith.truncf %0 : vector<16x32xf32> to vector<16x32xbf16>
    %c0_1 = arith.constant 0 : index
    %c0_2 = arith.constant 0 : index
    %2 = vector.load %arg3[%c0_1, %c0_2] : memref<32x32xbf16, #tpu.memory_space<vmem>>, vector<32x32xbf16>
    %cst = arith.constant dense<0.000000e+00> : vector<16x32xf32>
    %3 = tpu.matmul %1, %2, %cst {dimension_numbers = #tpu.dot_dimension_numbers<[1], [0], [0], [1], [0, 0, 1, 1], [], []>} : vector<16x32xbf16>, vector<32x32xbf16>, vector<16x32xf32> -> vector<16x32xf32>
    %c0_3 = arith.constant 0 : index
    %c0_4 = arith.constant 0 : index
    %4 = vector.load %arg4[%c0_3, %c0_4] : memref<1x32xf32, #tpu.memory_space<vmem>>, vector<1x32xf32>
    %5 = vector.broadcast %4 : vector<1x32xf32> to vector<16x32xf32>
    %6 = arith.addf %3, %5 : vector<16x32xf32>
    %7 = arith.truncf %6 : vector<16x32xf32> to vector<16x32xbf16>
    %c0_5 = arith.constant 0 : index
    %c0_6 = arith.constant 0 : index
    %8 = vector.load %arg5[%c0_5, %c0_6] : memref<16x32xbf16, #tpu.memory_space<vmem>>, vector<16x32xbf16>
    tpu.vector_store %arg5[%c0_5, %c0_6], %7 {strides = array<i32>} : memref<16x32xbf16, #tpu.memory_space<vmem>>, vector<16x32xbf16>,
    return
  }
  func.func @transform_0(%arg0: i32, %arg1: i32) -> (i32, i32) {
    %c0_i32 = arith.constant 0 : i32
    %c0_i32_0 = arith.constant 0 : i32
    return %arg0, %c0_i32 : i32, i32
  }
  func.func @transform_1(%arg0: i32, %arg1: i32) -> (i32, i32) {
    %c0_i32 = arith.constant 0 : i32
    %c0_i32_0 = arith.constant 0 : i32
    return %c0_i32, %arg1 : i32, i32
  }
  func.func @transform_2(%arg0: i32, %arg1: i32) -> (i32, i32) {
    %c0_i32 = arith.constant 0 : i32
    %c0_i32_0 = arith.constant 0 : i32
    return %c0_i32, %arg1 : i32, i32
  }
  func.func @transform_3(%arg0: i32, %arg1: i32) -> (i32, i32) {
    %c0_i32 = arith.constant 0 : i32
    return %arg0, %arg1 : i32, i32
  }
}

module attributes {stable_mosaic.version = 11 : i64} {
  func.func @_linear_kernel(%arg0: i32, %arg1: i32, %arg2: memref<16x32xf32, #tpu.memory_space<vmem>>, %arg3: memref<32x64xbf16, #tpu.memory_space<vmem>>, %arg4: memref<1x64xf32, #tpu.memory_space<vmem>>, %arg5: memref<16x64xf32, #tpu.memory_space<vmem>>) attributes {dimension_semantics = [#tpu.dimension_semantics<parallel>, #tpu.dimension_semantics<parallel>], iteration_bounds = array<i64: 1, 1>, scalar_prefetch = 0 : i64, scratch_operands = 0 : i64, tpu.core_type = #tpu.core_type<tc>, window_params = [{transform_indices = @transform_0, window_bounds = array<i64: 16, 32>}, {transform_indices = @transform_1, window_bounds = array<i64: 32, 64>}, {transform_indices = @transform_2, window_bounds = array<i64: 1, 64>}, {transform_indices = @transform_3, window_bounds = array<i64: 16, 64>}]} {
    %c0 = arith.constant 0 : index
    %c0_0 = arith.constant 0 : index
    %0 = vector.load %arg2[%c0, %c0_0] : memref<16x32xf32, #tpu.memory_space<vmem>>, vector<16x32xf32>
    %1 = arith.truncf %0 : vector<16x32xf32> to vector<16x32xbf16>
    %c0_1 = arith.constant 0 : index
    %c0_2 = arith.constant 0 : index
    %2 = vector.load %arg3[%c0_1, %c0_2] : memref<32x64xbf16, #tpu.memory_space<vmem>>, vector<32x64xbf16>
    %cst = arith.constant dense<0.000000e+00> : vector<16x64xf32>
    %3 = tpu.matmul %1, %2, %cst {dimension_numbers = #tpu.dot_dimension_numbers<[1], [0], [0], [1], [0, 0, 1, 1], [], []>} : vector<16x32xbf16>, vector<32x64xbf16>, vector<16x64xf32> -> vector<16x64xf32>
    %c0_3 = arith.constant 0 : index
    %c0_4 = arith.constant 0 : index
    %4 = vector.load %arg4[%c0_3, %c0_4] : memref<1x64xf32, #tpu.memory_space<vmem>>, vector<1x64xf32>
    %5 = vector.broadcast %4 : vector<1x64xf32> to vector<16x64xf32>
    %6 = arith.addf %3, %5 : vector<16x64xf32>
    %c0_5 = arith.constant 0 : index
    %c0_6 = arith.constant 0 : index
    %7 = vector.load %arg5[%c0_5, %c0_6] : memref<16x64xf32, #tpu.memory_space<vmem>>, vector<16x64xf32>
    tpu.vector_store %arg5[%c0_5, %c0_6], %6 {strides = array<i32>} : memref<16x64xf32, #tpu.memory_space<vmem>>, vector<16x64xf32>,
    return
  }
  func.func @transform_0(%arg0: i32, %arg1: i32) -> (i32, i32) {
    %c0_i32 = arith.constant 0 : i32
    %c0_i32_0 = arith.constant 0 : i32
    return %arg0, %c0_i32 : i32, i32
  }
  func.func @transform_1(%arg0: i32, %arg1: i32) -> (i32, i32) {
    %c0_i32 = arith.constant 0 : i32
    %c0_i32_0 = arith.constant 0 : i32
    return %c0_i32, %arg1 : i32, i32
  }
  func.func @transform_2(%arg0: i32, %arg1: i32) -> (i32, i32) {
    %c0_i32 = arith.constant 0 : i32
    %c0_i32_0 = arith.constant 0 : i32
    return %c0_i32, %arg1 : i32, i32
  }
  func.func @transform_3(%arg0: i32, %arg1: i32) -> (i32, i32) {
    %c0_i32 = arith.constant 0 : i32
    return %arg0, %arg1 : i32, i32
  }
}

</mosaic_0001>

<bundles_post_ra>
// kernel: transformer_forward.25
= control target key start
LH: loop header
LB: loop body
LE: loop exit
PB: predicated region body
PF: predicated region fallthrough
CT: control target
= control target key end

     0   :  { %v124_v0 = vmov 0.0   ;;  %vm125_vm0 = vmmov 0   ;;  %vm41_vm1 = vcmask 261120   ;;  %vm94_vm2 = vcmask 781312   ;;  %s167_s1 = inlined_call_operand.vmem [shape: bf16[32,96], index: 1, kind: input, shape index: {}]   ;;  %s168_s0 = inlined_call_operand.vmem [shape: f32[16,32], index: 0, kind: input, shape index: {}]   ;;  %s169_s2 = inlined_call_operand.vmem [shape: f32[1,96], index: 2, kind: input, shape index: {}]   ;;  %s170_s3 = inlined_call_operand.vmem [shape: bf16[16,96], index: 3, kind: output, shape index: {}]  }
   0x1   :  { %112 = vmatprep.subr.bf16.mxu0 %v124_v0  ;;  %v122_v1 = vld [vmem:[%s167_s1] sm:$0xff]   ;;  %116 = vmatprep.mubr.msk.bf16.mxu0 %vm125_vm0, %v124_v0  ;;  %v123_v2 = vld [vmem:[%s167_s1 + $0x8] sm:$0xff]  }
   0x2   :  { %113 = vmatpush3.bf16.msra.mxu0 %v122_v1  ;;  %v15_v3 = vld [vmem:[%s168_s0] sm:$0xff]  ;;  %v16_v4 = vld [vmem:[%s168_s0 + $0x8] sm:$0xff] }
   0x3   :  { %114 = vmatprep.subr.bf16.mxu0 %v124_v0  ;;  %v17_v5 = vpack.c.bf16 %v16_v4, %v15_v3  ;;  %v101_v6 = vld [vmem:[%s169_s2] ss:$0 sm:$0xff] }
   0x6   :  { %115 = vmatpush3.bf16.msra.mxu0 %v123_v2 }
   0x9   :  { %117 = vmatmul.mubr.msk.bf16.vlgmr.msra.gmra.mrb[0].mxu0 %vm41_vm1, %v17_v5 }
  0xdc   :  { %v79_v7 = vpop.f32.mrb[0].mxu0 }
  0xdd   :  { %v80_v8 = vadd.f32 %v101_v6, %v79_v7  ;;  %v118_v9 = vpop.f32.mrb[1].mxu0 }
  0xde   :  { %v82_v10 = vpop.f32.mrb[2].mxu0 }
  0xdf   :  { %v107_v11 = vpack.c.bf16 %v80_v8, %v80_v8  ;;  %v83_v12 = vadd.f32 %v101_v6, %v82_v10  ;;  %v119_v13 = vpop.f32.mrb[3].mxu0 }
  0xe1   :  { %95 = vst.msk [vmem:[%s170_s3] sm:$0xf] %vm94_vm2, %v107_v11  ;;  %v108_v14 = vpack.c.bf16 %v83_v12, %v83_v12 }
  0xe3   :  { %96 = vst.msk [vmem:[%s170_s3 + $0x4] sm:$0xf] %vm94_vm2, %v108_v14 }

// kernel: transformer_forward.27
= control target key start
LH: loop header
LB: loop body
LE: loop exit
PB: predicated region body
PF: predicated region fallthrough
CT: control target
= control target key end

     0   :  { %v181_v0 = vmov 0.0   ;;  %vm182_vm0 = vmmov 0   ;;  %vm54_vm1 = vcmask 261120   ;;  %s255_s1 = inlined_call_operand.vmem [shape: bf16[32,32], index: 1, kind: input, shape index: {}]   ;;  %s256_s0 = inlined_call_operand.vmem [shape: bf16[16,32], index: 0, kind: input, shape index: {}]   ;;  %s257_s2 = inlined_call_operand.vmem [shape: f32[1,32], index: 2, kind: input, shape index: {}]   ;;  %s258_s3 = inlined_call_operand.vmem [shape: f32[16,32], index: 3, kind: input, shape index: {}]   ;;  %s259_s4 = inlined_call_operand.vmem [shape: f32[1,32], index: 4, kind: input, shape index: {}]   ;;  %s260_s5 = inlined_call_operand.vmem [shape: f32[1,32], index: 5, kind: input, shape index: {}]   ;;  %s261_s6 = inlined_call_operand.vmem [shape: f32[16,32], index: 6, kind: output, shape index: {}]  }
   0x1   :  { %164 = vmatprep.subr.bf16.mxu0 %v181_v0  ;;  %v174_v1 = vld [vmem:[%s255_s1] sm:$0xff]   ;;  %168 = vmatprep.mubr.msk.bf16.mxu0 %vm182_vm0, %v181_v0  ;;  %v175_v2 = vld [vmem:[%s255_s1 + $0x8] sm:$0xff]  }
   0x2   :  { %165 = vmatpush3.bf16.msra.mxu0 %v174_v1  ;;  %v176_v3 = vld [vmem:[%s256_s0] sm:$0xff]   ;;  %v100_v10 = vld [vmem:[%s258_s3 + $0x8] sm:$0xff] }
   0x3   :  { %166 = vmatprep.subr.bf16.mxu0 %v181_v0  ;;  %v154_v4 = vld [vmem:[%s257_s2] ss:$0 sm:$0xff] }
   0x4   :  { %v99_v6 = vld [vmem:[%s258_s3] sm:$0xff] }
   0x5   :  { %v159_v34 = vld [vmem:[%s259_s4] ss:$0 sm:$0xff] }
   0x6   :  { %167 = vmatpush3.bf16.msra.mxu0 %v175_v2  ;;  %v160_v36 = vld [vmem:[%s260_s5] ss:$0 sm:$0xff] }
   0x9   :  { %169 = vmatmul.mubr.msk.bf16.vlgmr.msra.gmra.mrb[0].mxu0 %vm54_vm1, %v176_v3 }
  0xdc   :  { %v92_v5 = vpop.f32.mrb[0].mxu0 }
  0xdd   :  { %v93_v7 = vadd.f32 %v154_v4, %v92_v5  ;;  %v170_v8 = vpop.f32.mrb[1].mxu0 }
  0xde   :  { %v95_v9 = vpop.f32.mrb[2].mxu0 }
  0xdf   :  { %v96_v11 = vadd.f32 %v154_v4, %v95_v9  ;;  %v171_v12 = vpop.f32.mrb[3].mxu0  ;;  %v101_v13 = vadd.f32 %v99_v6, %v93_v7 }
  0xe1   :  { %v103_v14 = vsel %vm54_vm1, %v101_v13, 0.0  ;;  %v102_v15 = vadd.f32 %v100_v10, %v96_v11 }
  0xe2   :  { %104 = vadd.xlane.f32.xlu0 %v103_v14 }
  0xe3   :  { %v106_v16 = vsel %vm54_vm1, %v102_v15, 0.0 }
  0xe6   :  { %107 = vadd.xlane.f32.xlu0 %v106_v16 }
 0x16f   :  { %v105_v17 = vpop.xlane.xlu0 %104 }
 0x170   :  { %v110_v18 = vmul.f32 0.03125, %v105_v17 }
 0x172   :  { %v112_v19 = vsub.f32 %v101_v13, %v110_v18 }
 0x173   :  { %v108_v20 = vpop.xlane.xlu0 %107 }
 0x174   :  { %v111_v21 = vmul.f32 0.03125, %v108_v20  ;;  %v114_v22 = vmul.f32 %v112_v19, %v112_v19 }
 0x176   :  { %v113_v23 = vsub.f32 %v102_v15, %v111_v21  ;;  %v116_v24 = vsel %vm54_vm1, %v114_v22, 0.0 }
 0x177   :  { %117 = vadd.xlane.f32.xlu1 %v116_v24 }
 0x178   :  { %v115_v25 = vmul.f32 %v113_v23, %v113_v23 }
 0x17a   :  { %v119_v26 = vsel %vm54_vm1, %v115_v25, 0.0 }
 0x17b   :  { %120 = vadd.xlane.f32.xlu1 %v119_v26 }
 0x204   :  { %v118_v27 = vpop.xlane.xlu1 %117 }
 0x205   :  { %v122_v28 = vmul.f32 0.03125, %v118_v27 }
 0x207   :  { %v124_v29 = vadd.f32 1e-05, %v122_v28 }
 0x208   :  { %v121_v30 = vpop.xlane.xlu1 %120 }
 0x209   :  { %177 = vrsqrt.f32 %v124_v29  ;;  %v123_v31 = vmul.f32 0.03125, %v121_v30 }
 0x20b   :  { %v125_v32 = vadd.f32 1e-05, %v123_v31 }
 0x20d   :  { %179 = vrsqrt.f32 %v125_v32 }
 0x213   :  { %v178_v33 = vpop.eup %177 }
 0x214   :  { %v128_v35 = vmul.f32 %v178_v33, %v112_v19 }
 0x216   :  { %v137_v37 = vmul.f32 %v159_v34, %v128_v35 }
 0x217   :  { %v180_v38 = vpop.eup %179 }
 0x218   :  { %v146_v39 = vadd.f32 %v160_v36, %v137_v37  ;;  %v129_v40 = vmul.f32 %v180_v38, %v113_v23 }
 0x21a   :  { %148 = vst.msk [vmem:[%s261_s6] sm:$0xff] %vm54_vm1, %v146_v39  ;;  %v138_v41 = vmul.f32 %v159_v34, %v129_v40 }
 0x21c   :  { %v147_v42 = vadd.f32 %v160_v36, %v138_v41 }
 0x21e   :  { %149 = vst.msk [vmem:[%s261_s6 + $0x8] sm:$0xff] %vm54_vm1, %v147_v42 }

// kernel: transformer_forward.26
= control target key start
LH: loop header
LB: loop body
LE: loop exit
PB: predicated region body
PF: predicated region fallthrough
CT: control target
= control target key end

     0   :  { %s863_s18 = smov 0   ;;  %s865_s19 = smov 0   ;;  %s941_s0 = inlined_call_operand.vmem [shape: f32[2,8,1], index: 0, kind: input, shape index: {}]   ;;  %s942_s1 = inlined_call_operand.vmem [shape: f32[2,1,8], index: 1, kind: input, shape index: {}]   ;;  %s943_s2 = inlined_call_operand.vmem [shape: bf16[2,8,32], index: 2, kind: input, shape index: {}]   ;;  %s944_s3 = inlined_call_operand.vmem [shape: bf16[2,8,32], index: 3, kind: input, shape index: {}]   ;;  %s945_s4 = inlined_call_operand.vmem [shape: bf16[2,8,32], index: 4, kind: input, shape index: {}]   ;;  %s946_s5 = inlined_call_operand.vmem [shape: bf16[2,8,32], index: 5, kind: output, shape index: {}]  }
   0x1   :  { %s867_s20 = smov 0  }
   0x2 LB: > { %s27_s21 = sadd.s32 1, %s822_s19  ;;  %p716_p0 = scmp.ge.s32.totalorder %s826_s20, 1  ;;  %s826_s20 = sphi %s867_s20, %s15_s20   ;;  %s822_s19 = sphi %s865_s19, %s948_s19   ;;  %s818_s18 = sphi %s863_s18, %s947_s18  }
   0x3   : > { %p29_p1 = scmp.ge.s32.totalorder %s27_s21, 2  ;;  %p245_p2 = scmp.lt.s32.totalorder %s826_s20, 3 }
   0x5   : > { %s950_s21 = smov (%p29_p1, %s27_s21), 0  ;;  %p246_p3 = pnand %p716_p0, %p245_p2 }
   0x6   : > { %p295_p4 = scmp.lt.s32.totalorder (!%p246_p3), %s818_s18, 1  ;;  %v828_v0 = vmov (!%p246_p3), 0   ;;  %v829_v1 = vmov (!%p246_p3), 0.0   ;;  %vm830_vm0 = vmmov (!%p246_p3), 0   ;;  %vm357_vm1 = vcmask (!%p246_p3), 130048   ;;  %s831_s11 = smov (!%p246_p3), 112  }
   0x7   : > { %249 = sbr.rel (%p246_p3) target bundleno = 1172 (0x494), region = 40  ;;  %793 = vset.pattern.permute.xlu0 (!%p246_p3), %v828_v0  ;;  %740 = vmatprep.subr.bf16.mxu0 (!%p246_p3), %v829_v1  ;;  %vm343_vm2 = vcmask (!%p246_p3), 64512   ;;  %vm417_vm5 = vcmask (!%p246_p3), 1043456   ;;  %s832_s15 = smov (!%p246_p3), 16   ;;  %vm588_vm6 = vcmask (!%p246_p3), 257024  }
   0x8   : > { %742 = vmatprep.mubr.msk.bf16.mxu0 (!%p246_p3), %vm830_vm0, %v829_v1  ;;  %746 = vmatprep.subr.bf16.mxu1 (!%p246_p3), %v829_v1 }
   0x9   : > { %748 = vmatprep.mubr.msk.bf16.mxu1 (!%p246_p3), %vm830_vm0, %v829_v1 }
   0xe   : > { %s952_s18 = smov (!%p295_p4, %s818_s18), 1 }
   0xf   : > { %s717_s22 = sshll.u32 %s952_s18, 3  ;;  %s887_s23 = sshll.u32 %s952_s18, 2 }
  0x10   : > { %s301_s26 = scalar_lea.vmem %s941_s0, %s717_s22  ;;  %s315_s29 = scalar_lea.vmem %s944_s3, %s887_s23 }
  0x11   : > { %v329_v2 = vld [vmem:[%s301_s26] sm:$0xff]  ;;  %s311_s7 = scalar_lea.vmem %s943_s2, %s887_s23  ;;  %s304_s10 = scalar_lea.vmem %s942_s1, %s952_s18 }
  0x12   : > { %v355_v3 = vld [vmem:[%s315_s29] sm:$0xf]  ;;  %333 = vperm.xlu0 %793, %v329_v2   ;;  %s319_s14 = scalar_lea.vmem %s945_s4, %s887_s23  ;;  %s326_s18 = scalar_lea.vmem %s946_s5, %s887_s23 }
  0x13   : > { %v362_v4 = vsel %vm357_vm1, %v355_v3, 0  ;;  %v353_v5 = vld [vmem:[%s311_s7] sm:$0xf]  ;;  %v726_v20 = vcombine.low %v355_v3, %v355_v3 }
  0x14   : > { %741 = vmatpush3.bf16.xpose.msra.mxu0 %v362_v4  ;;  %v354_v6 = vmul.bf16 1048592000, %v353_v5  ;;  %v722_v7 = vld [vmem:[%s304_s10] ss:$0 sm:$0xff] }
  0x15   : > { %758 = vmatprep.subr.bf16.mxu0 %v829_v1  ;;  %v356_v22 = vld [vmem:[%s319_s14] sm:$0xf] }
  0x16   : > { %v725_v21 = vcombine.low %v354_v6, %v354_v6  ;;  %v419_v23 = vsel %vm417_vm5, %v356_v22, 0  ;;  %v728_v24 = vcombine.low %v356_v22, %v356_v22 }
  0x17   : > { %747 = vmatpush3.bf16.msra.mxu1 %v419_v23 }
  0x18   : > { %752 = vmatprep.subr.bf16.mxu1 %v829_v1 }
  0x1b   : > { %743 = vmatmul.mubr.msk.bf16.vlgmr.msra.gmra.mrb[0].mxu0 %vm357_vm1, %v354_v6 }
  0x1c   : > { %760 = vmatprep.mubr.msk.bf16.mxu0 %vm830_vm0, %v829_v1 }
  0x91   : > { %v334_v8 = vpop.permute.xlu0 %333 }
  0x92   : > { %v342_v9 = vmul.f32 %v722_v7, %v334_v8 }
  0x94   : > { %v344_v10 = vsel %vm343_vm2, %v342_v9, 0.0 }
  0x95   : > { %345 = vadd.xlane.f32.xlu0 %v344_v10 }
  0xab   : > { %532 = vrot.lane.b32.xlu0 %v728_v24, %s831_s11 }
  0xee   : > { %v398_v11 = vpop.f32.mrb[0].mxu0 }
  0xef   : > { %v744_v12 = vpop.f32.mrb[1].mxu0 }
  0xf0   : > { %v401_v13 = vpop.f32.mrb[2].mxu0 }
  0xf1   : > { %v745_v14 = vpop.f32.mrb[3].mxu0 }
 0x122   : > { %v346_v15 = vpop.xlane.xlu0 %345 }
 0x123   : > { %vm347_vm3 = vcmp.eq.f32.partialorder %v346_v15, 0.0 }
 0x124   : > { %v350_v16 = vsel %vm347_vm3, 1.0, %v342_v9 }
 0x125   : > { %vm351_vm4 = vcmp.eq.f32.partialorder %v350_v16, 0.0 }
 0x126   : > { %v352_v17 = vsel %vm351_vm4, -inf, %v829_v1  ;;  %v533_v44 = vpop.permute.xlu0 %532 }
 0x127   : > { %v399_v18 = vadd.f32 %v398_v11, %v352_v17  ;;  %v538_v45 = vsel %vm417_vm5, %v533_v44, 0 }
 0x128   : > { %759 = vmatpush3.bf16.msra.mxu0 %v538_v45 }
 0x129   : > { %v404_v19 = vsel %vm343_vm2, %v399_v18, -inf }
 0x12a   : > { %405 = vmax.xlane.f32.xlu1 %v404_v19 }
 0x13b   : > { %471 = vrot.lane.b32.xlu1 %v726_v20, %s831_s11 }
 0x13f   : > { %466 = vrot.lane.b32.xlu1 %v725_v21, %s831_s11 }
 0x1b7   : > { %v406_v25 = vpop.xlane.xlu1 %405 }
 0x1b8   : > { %v407_v26 = vsub.f32 %v399_v18, %v406_v25 }
 0x1ba   : > { %v408_v27 = vmul.f32 1.442695, %v407_v26 }
 0x1bb   : > { %v472_v28 = vpop.permute.xlu1 %471 }
 0x1bc   : > { %796 = vpow2.f32 %v408_v27  ;;  %v477_v30 = vsel %vm357_vm1, %v472_v28, 0 }
 0x1bf   : > { %v467_v32 = vpop.permute.xlu1 %466 }
 0x1c6   : > { %v797_v29 = vpop.eup %796 }
 0x1c7   : > { %v413_v31 = vpack.c.bf16 %v797_v29, %v797_v29  ;;  %v410_v43 = vsel %vm343_vm2, %v797_v29, 0.0 }
 0x1c9   : > { %749 = vmatmul.mubr.msk.bf16.vlgmr.msra.gmra.mrb[0].mxu1 %vm343_vm2, %v413_v31 }
 0x1ca   : > { %753 = vmatpush3.bf16.xpose.msra.mxu1 %v477_v30  ;;  %754 = vmatprep.mubr.msk.bf16.mxu1 %vm830_vm0, %v829_v1 }
 0x1d1   : > { %755 = vmatmul.mubr.msk.bf16.vlgmr.msra.gmra.mrb[4].mxu1 %vm357_vm1, %v467_v32 }
 0x29c   : > { %v455_v33 = vpop.f32.mrb[0].mxu1 }
 0x29d   : > { %v750_v34 = vpop.f32.mrb[1].mxu1 }
 0x29e   : > { %v458_v35 = vpop.f32.mrb[2].mxu1 }
 0x29f   : > { %v751_v36 = vpop.f32.mrb[3].mxu1 }
 0x2a4   : > { %v513_v37 = vpop.f32.mrb[4].mxu1 }
 0x2a5   : > { %v514_v38 = vadd.f32 %v513_v37, %v352_v17  ;;  %v756_v39 = vpop.f32.mrb[5].mxu1 }
 0x2a6   : > { %v516_v40 = vpop.f32.mrb[6].mxu1 }
 0x2a7   : > { %v757_v41 = vpop.f32.mrb[7].mxu1  ;;  %v519_v42 = vsel %vm343_vm2, %v514_v38, -inf }
 0x2a8   : > { %520 = vmax.xlane.f32.xlu1 %v519_v42 }
 0x2ac   : > { %411 = vadd.xlane.f32.xlu1 %v410_v43 }
 0x335   : > { %v521_v46 = vpop.xlane.xlu1 %520 }
 0x336   : > { %v522_v47 = vsub.f32 %v514_v38, %v521_v46 }
 0x338   : > { %v523_v48 = vmul.f32 1.442695, %v522_v47 }
 0x339   : > { %v412_v59 = vpop.xlane.xlu1 %411 }
 0x33a   : > { %798 = vpow2.f32 %v523_v48 }
 0x344   : > { %v799_v49 = vpop.eup %798 }
 0x345   : > { %v525_v50 = vsel %vm343_vm2, %v799_v49, 0.0  ;;  %v528_v51 = vpack.c.bf16 %v799_v49, %v799_v49 }
 0x346   : > { %526 = vadd.xlane.f32.xlu0 %v525_v50 }
 0x347   : > { %761 = vmatmul.mubr.msk.bf16.vlgmr.msra.gmra.mrb[4].mxu0 %vm343_vm2, %v528_v51 }
 0x3d3   : > { %v527_v52 = vpop.xlane.xlu0 %526 }
 0x3d4   : > { %800 = vrcp.f32 %v527_v52 }
 0x3d5   : > { %802 = vrcp.f32 %v412_v59 }
 0x3de   : > { %v801_v53 = vpop.eup %800 }
 0x3df   : > { %v803_v60 = vpop.eup %802 }
 0x3e0   : > { %v462_v61 = vmul.f32 %v803_v60, %v455_v33 }
 0x41a   : > { %v574_v54 = vpop.f32.mrb[4].mxu0 }
 0x41b   : > { %v581_v55 = vmul.f32 %v801_v53, %v574_v54  ;;  %v762_v56 = vpop.f32.mrb[5].mxu0 }
 0x41c   : > { %v577_v57 = vpop.f32.mrb[6].mxu0 }
 0x41d   : > { %v763_v58 = vpop.f32.mrb[7].mxu0  ;;  %583 = vrot.lane.b32.xlu1 %v581_v55, %s832_s15 }
 0x48f   : > { %v584_v62 = vpop.permute.xlu1 %583 }
 0x490   : > { %v586_v63 = vsel %vm357_vm1, %v462_v61, %v584_v62 }
 0x491   : > { %v587_v0 = vpack.c.bf16 %v586_v63, %v586_v63 }
 0x493   : > { %589 = vst.msk [vmem:[%s326_s18] sm:$0xf] %vm588_vm6, %v587_v0 }
 0x494 PF: > { %s15_s20 = sadd.s32 1, %s826_s20   ;;  %s947_s18 = smov %s822_s19 }
 0x495   : > { %p12_p5 = scmp.ge.s32.totalorder %s15_s20, 4   ;;  %s948_s19 = smov %s950_s21 }
 0x497   :  { %14 = sbr.rel (!%p12_p5) target bundleno = 2 (0x2), region = 82 }

// kernel: transformer_forward.28
= control target key start
LH: loop header
LB: loop body
LE: loop exit
PB: predicated region body
PF: predicated region fallthrough
CT: control target
= control target key end

     0   :  { %vm31_vm0 = vcmask 261120   ;;  %v312_v0 = vmov 0.0   ;;  %vm313_vm1 = vmmov 0   ;;  %vm142_vm2 = vcmask 523264   ;;  %s407_s1 = inlined_call_operand.vmem [shape: bf16[32,64], index: 1, kind: input, shape index: {}]   ;;  %s408_s0 = inlined_call_operand.vmem [shape: f32[16,32], index: 0, kind: input, shape index: {}]   ;;  %s409_s3 = inlined_call_operand.vmem [shape: bf16[64,32], index: 3, kind: input, shape index: {}]   ;;  %s410_s2 = inlined_call_operand.vmem [shape: f32[1,64], index: 2, kind: input, shape index: {}]   ;;  %s411_s4 = inlined_call_operand.vmem [shape: f32[1,32], index: 4, kind: input, shape index: {}]   ;;  %s412_s5 = inlined_call_operand.vmem [shape: f32[1,32], index: 5, kind: input, shape index: {}]   ;;  %s413_s6 = inlined_call_operand.vmem [shape: f32[1,32], index: 6, kind: input, shape index: {}]   ;;  %s414_s7 = inlined_call_operand.vmem [shape: f32[16,32], index: 7, kind: output, shape index: {}]  }
   0x1   :  { %280 = vmatprep.subr.bf16.mxu0 %v312_v0  ;;  %v302_v1 = vld [vmem:[%s407_s1] sm:$0xff]   ;;  %284 = vmatprep.mubr.msk.bf16.mxu0 %vm313_vm1, %v312_v0  ;;  %32 = vst.msk [vmem:[#allocation2] sm:$0xff] %vm31_vm0, %v312_v0  ;;  %33 = vst.msk [vmem:[#allocation2 + $0x8] sm:$0xff] %vm31_vm0, %v312_v0  ;;  %v303_v2 = vld [vmem:[%s407_s1 + $0x8] sm:$0xff]  }
   0x2   :  { %288 = vmatprep.subr.bf16.mxu1 %v312_v0  ;;  %296 = vmatprep.mubr.msk.bf16.mxu1 %vm313_vm1, %v312_v0  ;;  %v34_v3 = vld [vmem:[%s408_s0] sm:$0xff]  ;;  %v35_v4 = vld [vmem:[%s408_s0 + $0x8] sm:$0xff]  ;;  %v306_v8 = vld [vmem:[%s409_s3 + $0x10] sm:$0xff]  }
   0x3   :  { %281 = vmatpush3.bf16.msra.mxu0 %v302_v1  ;;  %v304_v5 = vld [vmem:[%s409_s3] sm:$0xff]   ;;  %v305_v6 = vld [vmem:[%s409_s3 + $0x8] sm:$0xff]   ;;  %v36_v7 = vpack.c.bf16 %v35_v4, %v34_v3  ;;  %v307_v9 = vld [vmem:[%s409_s3 + $0x18] sm:$0xff]  }
   0x4   :  { %282 = vmatprep.subr.bf16.mxu0 %v312_v0  ;;  %289 = vmatpush3.bf16.msra.mxu1 %v304_v5  ;;  %v260_v10 = vld [vmem:[%s410_s2] ss:$0 sm:$0xff] }
   0x5   :  { %290 = vmatprep.subr.bf16.mxu1 %v312_v0  ;;  %v269_v28 = vld [vmem:[%s411_s4] ss:$0 sm:$0xff] }
   0x6   :  { %v270_v54 = vld [vmem:[%s412_s5] ss:$0 sm:$0xff] }
   0x7   :  { %283 = vmatpush3.bf16.msra.mxu0 %v303_v2  ;;  %v271_v56 = vld [vmem:[%s413_s6] ss:$0 sm:$0xff] }
   0x8   :  { %291 = vmatpush3.bf16.msra.mxu1 %v305_v6  ;;  %v108_v20 = vld [vmem:[#allocation2] sm:$0xff]  ;;  %v109_v22 = vld [vmem:[#allocation2 + $0x8] sm:$0xff] }
   0x9   :  { %292 = vmatprep.subr.bf16.mxu1 %v312_v0 }
   0xa   :  { %285 = vmatmul.mubr.msk.bf16.vlgmr.msra.gmra.mrb[0].mxu0 %vm31_vm0, %v36_v7 }
   0xc   :  { %293 = vmatpush3.bf16.msra.mxu1 %v306_v8 }
   0xd   :  { %294 = vmatprep.subr.bf16.mxu1 %v312_v0 }
  0x10   :  { %295 = vmatpush3.bf16.msra.mxu1 %v307_v9 }
  0xdd   :  { %v98_v11 = vpop.f32.mrb[0].mxu0 }
  0xde   :  { %v99_v12 = vadd.f32 %v260_v10, %v98_v11  ;;  %v286_v13 = vpop.f32.mrb[1].mxu0 }
  0xdf   :  { %v101_v14 = vpop.f32.mrb[2].mxu0 }
  0xe0   :  { %v102_v15 = vadd.f32 %v260_v10, %v101_v14  ;;  %v287_v16 = vpop.f32.mrb[3].mxu0  ;;  %v105_v17 = vmax.f32 %v99_v12, 0.0 }
  0xe2   :  { %v106_v18 = vmax.f32 %v102_v15, 0.0 }
  0xe4   :  { %v107_v19 = vpack.c.bf16 %v106_v18, %v105_v17 }
  0xe6   :  { %297 = vmatmul.mubr.msk.bf16.vlgmr.msra.gmra.mrb[0].mxu1 %vm142_vm2, %v107_v19 }
 0x1b9   :  { %v180_v21 = vpop.f32.mrb[0].mxu1 }
 0x1ba   :  { %v187_v23 = vadd.f32 %v180_v21, %v108_v20  ;;  %v298_v24 = vpop.f32.mrb[1].mxu1 }
 0x1bb   :  { %v183_v25 = vpop.f32.mrb[2].mxu1 }
 0x1bc   :  { %189 = vst.msk [vmem:[#allocation2] sm:$0xff] %vm31_vm0, %v187_v23  ;;  %v188_v26 = vadd.f32 %v183_v25, %v109_v22  ;;  %v299_v27 = vpop.f32.mrb[3].mxu1 }
 0x1be   :  { %190 = vst.msk [vmem:[#allocation2 + $0x8] sm:$0xff] %vm31_vm0, %v188_v26 }
 0x1c3   :  { %v194_v29 = vld [vmem:[#allocation2] sm:$0xff] }
 0x1c4   :  { %v203_v30 = vadd.f32 %v269_v28, %v194_v29 }
 0x1c5   :  { %v195_v31 = vld [vmem:[#allocation2 + $0x8] sm:$0xff] }
 0x1c6   :  { %v207_v32 = vadd.f32 %v203_v30, %v34_v3  ;;  %v204_v33 = vadd.f32 %v269_v28, %v195_v31 }
 0x1c8   :  { %v209_v34 = vsel %vm31_vm0, %v207_v32, 0.0  ;;  %v208_v35 = vadd.f32 %v204_v33, %v35_v4 }
 0x1c9   :  { %210 = vadd.xlane.f32.xlu0 %v209_v34 }
 0x1ca   :  { %v212_v36 = vsel %vm31_vm0, %v208_v35, 0.0 }
 0x1cd   :  { %213 = vadd.xlane.f32.xlu0 %v212_v36 }
 0x256   :  { %v211_v37 = vpop.xlane.xlu0 %210 }
 0x257   :  { %v216_v38 = vmul.f32 0.03125, %v211_v37 }
 0x259   :  { %v218_v39 = vsub.f32 %v207_v32, %v216_v38 }
 0x25a   :  { %v214_v40 = vpop.xlane.xlu0 %213 }
 0x25b   :  { %v217_v41 = vmul.f32 0.03125, %v214_v40  ;;  %v220_v42 = vmul.f32 %v218_v39, %v218_v39 }
 0x25d   :  { %v219_v43 = vsub.f32 %v208_v35, %v217_v41  ;;  %v222_v44 = vsel %vm31_vm0, %v220_v42, 0.0 }
 0x25e   :  { %223 = vadd.xlane.f32.xlu1 %v222_v44 }
 0x25f   :  { %v221_v45 = vmul.f32 %v219_v43, %v219_v43 }
 0x261   :  { %v225_v46 = vsel %vm31_vm0, %v221_v45, 0.0 }
 0x262   :  { %226 = vadd.xlane.f32.xlu1 %v225_v46 }
 0x2eb   :  { %v224_v47 = vpop.xlane.xlu1 %223 }
 0x2ec   :  { %v228_v48 = vmul.f32 0.03125, %v224_v47 }
 0x2ee   :  { %v230_v49 = vadd.f32 1e-05, %v228_v48 }
 0x2ef   :  { %v227_v50 = vpop.xlane.xlu1 %226 }
 0x2f0   :  { %308 = vrsqrt.f32 %v230_v49  ;;  %v229_v51 = vmul.f32 0.03125, %v227_v50 }
 0x2f2   :  { %v231_v52 = vadd.f32 1e-05, %v229_v51 }
 0x2f4   :  { %310 = vrsqrt.f32 %v231_v52 }
 0x2fa   :  { %v309_v53 = vpop.eup %308 }
 0x2fb   :  { %v234_v55 = vmul.f32 %v309_v53, %v218_v39 }
 0x2fd   :  { %v243_v57 = vmul.f32 %v270_v54, %v234_v55 }
 0x2fe   :  { %v311_v58 = vpop.eup %310 }
 0x2ff   :  { %v252_v59 = vadd.f32 %v271_v56, %v243_v57  ;;  %v235_v60 = vmul.f32 %v311_v58, %v219_v43 }
 0x301   :  { %254 = vst.msk [vmem:[%s414_s7] sm:$0xff] %vm31_vm0, %v252_v59  ;;  %v244_v61 = vmul.f32 %v270_v54, %v235_v60 }
 0x303   :  { %v253_v62 = vadd.f32 %v271_v56, %v244_v61 }
 0x305   :  { %255 = vst.msk [vmem:[%s414_s7 + $0x8] sm:$0xff] %vm31_vm0, %v253_v62 }

// kernel: transformer_forward.37
= control target key start
LH: loop header
LB: loop body
LE: loop exit
PB: predicated region body
PF: predicated region fallthrough
CT: control target
= control target key end

     0   :  { %v124_v0 = vmov 0.0   ;;  %vm125_vm0 = vmmov 0   ;;  %vm41_vm1 = vcmask 261120   ;;  %vm94_vm2 = vcmask 519168   ;;  %s167_s1 = inlined_call_operand.vmem [shape: bf16[32,64], index: 1, kind: input, shape index: {}]   ;;  %s168_s0 = inlined_call_operand.vmem [shape: f32[16,32], index: 0, kind: input, shape index: {}]   ;;  %s169_s2 = inlined_call_operand.vmem [shape: f32[1,64], index: 2, kind: input, shape index: {}]   ;;  %s170_s3 = inlined_call_operand.vmem [shape: bf16[16,64], index: 3, kind: output, shape index: {}]  }
   0x1   :  { %112 = vmatprep.subr.bf16.mxu0 %v124_v0  ;;  %v122_v1 = vld [vmem:[%s167_s1] sm:$0xff]   ;;  %116 = vmatprep.mubr.msk.bf16.mxu0 %vm125_vm0, %v124_v0  ;;  %v123_v2 = vld [vmem:[%s167_s1 + $0x8] sm:$0xff]  }
   0x2   :  { %113 = vmatpush3.bf16.msra.mxu0 %v122_v1  ;;  %v15_v3 = vld [vmem:[%s168_s0] sm:$0xff]  ;;  %v16_v4 = vld [vmem:[%s168_s0 + $0x8] sm:$0xff] }
   0x3   :  { %114 = vmatprep.subr.bf16.mxu0 %v124_v0  ;;  %v17_v5 = vpack.c.bf16 %v16_v4, %v15_v3  ;;  %v101_v6 = vld [vmem:[%s169_s2] ss:$0 sm:$0xff] }
   0x6   :  { %115 = vmatpush3.bf16.msra.mxu0 %v123_v2 }
   0x9   :  { %117 = vmatmul.mubr.msk.bf16.vlgmr.msra.gmra.mrb[0].mxu0 %vm41_vm1, %v17_v5 }
  0xdc   :  { %v79_v7 = vpop.f32.mrb[0].mxu0 }
  0xdd   :  { %v80_v8 = vadd.f32 %v101_v6, %v79_v7  ;;  %v118_v9 = vpop.f32.mrb[1].mxu0 }
  0xde   :  { %v82_v10 = vpop.f32.mrb[2].mxu0 }
  0xdf   :  { %v107_v11 = vpack.c.bf16 %v80_v8, %v80_v8  ;;  %v83_v12 = vadd.f32 %v101_v6, %v82_v10  ;;  %v119_v13 = vpop.f32.mrb[3].mxu0 }
  0xe1   :  { %95 = vst.msk [vmem:[%s170_s3] sm:$0xf] %vm94_vm2, %v107_v11  ;;  %v108_v14 = vpack.c.bf16 %v83_v12, %v83_v12 }
  0xe3   :  { %96 = vst.msk [vmem:[%s170_s3 + $0x4] sm:$0xf] %vm94_vm2, %v108_v14 }

// kernel: transformer_forward.36
= control target key start
LH: loop header
LB: loop body
LE: loop exit
PB: predicated region body
PF: predicated region fallthrough
CT: control target
= control target key end

     0   :  { %v124_v0 = vmov 0.0   ;;  %vm125_vm0 = vmmov 0   ;;  %vm41_vm1 = vcmask 261120   ;;  %vm94_vm2 = vcmask 257024   ;;  %s167_s1 = inlined_call_operand.vmem [shape: bf16[32,32], index: 1, kind: input, shape index: {}]   ;;  %s168_s0 = inlined_call_operand.vmem [shape: f32[16,32], index: 0, kind: input, shape index: {}]   ;;  %s169_s2 = inlined_call_operand.vmem [shape: f32[1,32], index: 2, kind: input, shape index: {}]   ;;  %s170_s3 = inlined_call_operand.vmem [shape: bf16[16,32], index: 3, kind: output, shape index: {}]  }
   0x1   :  { %112 = vmatprep.subr.bf16.mxu0 %v124_v0  ;;  %v122_v1 = vld [vmem:[%s167_s1] sm:$0xff]   ;;  %116 = vmatprep.mubr.msk.bf16.mxu0 %vm125_vm0, %v124_v0  ;;  %v123_v2 = vld [vmem:[%s167_s1 + $0x8] sm:$0xff]  }
   0x2   :  { %113 = vmatpush3.bf16.msra.mxu0 %v122_v1  ;;  %v15_v3 = vld [vmem:[%s168_s0] sm:$0xff]  ;;  %v16_v4 = vld [vmem:[%s168_s0 + $0x8] sm:$0xff] }
   0x3   :  { %114 = vmatprep.subr.bf16.mxu0 %v124_v0  ;;  %v17_v5 = vpack.c.bf16 %v16_v4, %v15_v3  ;;  %v101_v6 = vld [vmem:[%s169_s2] ss:$0 sm:$0xff] }
   0x6   :  { %115 = vmatpush3.bf16.msra.mxu0 %v123_v2 }
   0x9   :  { %117 = vmatmul.mubr.msk.bf16.vlgmr.msra.gmra.mrb[0].mxu0 %vm41_vm1, %v17_v5 }
  0xdc   :  { %v79_v7 = vpop.f32.mrb[0].mxu0 }
  0xdd   :  { %v80_v8 = vadd.f32 %v101_v6, %v79_v7  ;;  %v118_v9 = vpop.f32.mrb[1].mxu0 }
  0xde   :  { %v82_v10 = vpop.f32.mrb[2].mxu0 }
  0xdf   :  { %v107_v11 = vpack.c.bf16 %v80_v8, %v80_v8  ;;  %v83_v12 = vadd.f32 %v101_v6, %v82_v10  ;;  %v119_v13 = vpop.f32.mrb[3].mxu0 }
  0xe1   :  { %95 = vst.msk [vmem:[%s170_s3] sm:$0xf] %vm94_vm2, %v107_v11  ;;  %v108_v14 = vpack.c.bf16 %v83_v12, %v83_v12 }
  0xe3   :  { %96 = vst.msk [vmem:[%s170_s3 + $0x4] sm:$0xf] %vm94_vm2, %v108_v14 }

// kernel: transformer_forward.34
= control target key start
LH: loop header
LB: loop body
LE: loop exit
PB: predicated region body
PF: predicated region fallthrough
CT: control target
= control target key end

     0   :  { %s872_s18 = smov 0   ;;  %s874_s19 = smov 0   ;;  %s950_s0 = inlined_call_operand.vmem [shape: f32[2,8,1], index: 0, kind: input, shape index: {}]   ;;  %s951_s1 = inlined_call_operand.vmem [shape: f32[2,1,8], index: 1, kind: input, shape index: {}]   ;;  %s952_s2 = inlined_call_operand.vmem [shape: bf16[2,8,32], index: 2, kind: input, shape index: {}]   ;;  %s953_s3 = inlined_call_operand.vmem [shape: bf16[2,8,32], index: 3, kind: input, shape index: {}]   ;;  %s954_s4 = inlined_call_operand.vmem [shape: bf16[2,8,32], index: 4, kind: input, shape index: {}]   ;;  %s955_s5 = inlined_call_operand.vmem [shape: bf16[2,8,32], index: 5, kind: output, shape index: {}]  }
   0x1   :  { %s876_s20 = smov 0  }
   0x2 LB: > { %s27_s21 = sadd.s32 1, %s831_s19  ;;  %p725_p0 = scmp.ge.s32.totalorder %s835_s20, 1  ;;  %s835_s20 = sphi %s876_s20, %s15_s20   ;;  %s831_s19 = sphi %s874_s19, %s957_s19   ;;  %s827_s18 = sphi %s872_s18, %s956_s18  }
   0x3   : > { %p29_p1 = scmp.ge.s32.totalorder %s27_s21, 2  ;;  %p245_p2 = scmp.lt.s32.totalorder %s835_s20, 3 }
   0x5   : > { %s959_s21 = smov (%p29_p1, %s27_s21), 0  ;;  %p246_p3 = pnand %p725_p0, %p245_p2 }
   0x6   : > { %p295_p4 = scmp.lt.s32.totalorder (!%p246_p3), %s827_s18, 1  ;;  %v837_v0 = vmov (!%p246_p3), 0   ;;  %v838_v1 = vmov (!%p246_p3), 0.0   ;;  %vm839_vm0 = vmmov (!%p246_p3), 0   ;;  %vm366_vm1 = vcmask (!%p246_p3), 130048   ;;  %s840_s11 = smov (!%p246_p3), 112  }
   0x7   : > { %249 = sbr.rel (%p246_p3) target bundleno = 1173 (0x495), region = 40  ;;  %802 = vset.pattern.permute.xlu0 (!%p246_p3), %v837_v0  ;;  %749 = vmatprep.subr.bf16.mxu0 (!%p246_p3), %v838_v1  ;;  %vm343_vm2 = vcmask (!%p246_p3), 64512   ;;  %v353_v15 = vlaneseq (!%p246_p3)  ;;  %vm426_vm6 = vcmask (!%p246_p3), 1043456   ;;  %s841_s15 = smov (!%p246_p3), 16   ;;  %vm597_vm7 = vcmask (!%p246_p3), 257024  }
   0x8   : > { %751 = vmatprep.mubr.msk.bf16.mxu0 (!%p246_p3), %vm839_vm0, %v838_v1  ;;  %755 = vmatprep.subr.bf16.mxu1 (!%p246_p3), %v838_v1 }
   0x9   : > { %757 = vmatprep.mubr.msk.bf16.mxu1 (!%p246_p3), %vm839_vm0, %v838_v1  ;;  %v354_v16 = vshrl.u32 (!%p246_p3), %v353_v15, 7  ;;  %v359_v17 = vand.u32 (!%p246_p3), 127, %v353_v15 }
   0xb   : > { %vm360_vm4 = vcmp.gt.s32.totalorder (!%p246_p3), %v359_v17, %v354_v16 }
   0xe   : > { %s961_s18 = smov (!%p295_p4, %s827_s18), 1 }
   0xf   : > { %s726_s22 = sshll.u32 %s961_s18, 3  ;;  %s896_s23 = sshll.u32 %s961_s18, 2 }
  0x10   : > { %s301_s26 = scalar_lea.vmem %s950_s0, %s726_s22  ;;  %s315_s29 = scalar_lea.vmem %s953_s3, %s896_s23 }
  0x11   : > { %v329_v2 = vld [vmem:[%s301_s26] sm:$0xff]  ;;  %s311_s7 = scalar_lea.vmem %s952_s2, %s896_s23  ;;  %s304_s10 = scalar_lea.vmem %s951_s1, %s961_s18 }
  0x12   : > { %v364_v3 = vld [vmem:[%s315_s29] sm:$0xf]  ;;  %333 = vperm.xlu0 %802, %v329_v2   ;;  %s319_s14 = scalar_lea.vmem %s954_s4, %s896_s23  ;;  %s326_s18 = scalar_lea.vmem %s955_s5, %s896_s23 }
  0x13   : > { %v371_v4 = vsel %vm366_vm1, %v364_v3, 0  ;;  %v362_v5 = vld [vmem:[%s311_s7] sm:$0xf]  ;;  %v735_v24 = vcombine.low %v364_v3, %v364_v3 }
  0x14   : > { %750 = vmatpush3.bf16.xpose.msra.mxu0 %v371_v4  ;;  %v363_v6 = vmul.bf16 1048592000, %v362_v5  ;;  %v731_v7 = vld [vmem:[%s304_s10] ss:$0 sm:$0xff] }
  0x15   : > { %767 = vmatprep.subr.bf16.mxu0 %v838_v1  ;;  %v365_v26 = vld [vmem:[%s319_s14] sm:$0xf] }
  0x16   : > { %v734_v25 = vcombine.low %v363_v6, %v363_v6  ;;  %v428_v27 = vsel %vm426_vm6, %v365_v26, 0  ;;  %v737_v28 = vcombine.low %v365_v26, %v365_v26 }
  0x17   : > { %756 = vmatpush3.bf16.msra.mxu1 %v428_v27 }
  0x18   : > { %761 = vmatprep.subr.bf16.mxu1 %v838_v1 }
  0x1b   : > { %752 = vmatmul.mubr.msk.bf16.vlgmr.msra.gmra.mrb[0].mxu0 %vm366_vm1, %v363_v6 }
  0x1c   : > { %769 = vmatprep.mubr.msk.bf16.mxu0 %vm839_vm0, %v838_v1 }
  0x91   : > { %v334_v8 = vpop.permute.xlu0 %333 }
  0x92   : > { %v342_v9 = vmul.f32 %v731_v7, %v334_v8 }
  0x94   : > { %v344_v10 = vsel %vm343_vm2, %v342_v9, 0.0 }
  0x95   : > { %345 = vadd.xlane.f32.xlu0 %v344_v10 }
  0xab   : > { %541 = vrot.lane.b32.xlu0 %v737_v28, %s840_s11 }
  0xee   : > { %v407_v11 = vpop.f32.mrb[0].mxu0 }
  0xef   : > { %v753_v12 = vpop.f32.mrb[1].mxu0 }
  0xf0   : > { %v410_v13 = vpop.f32.mrb[2].mxu0 }
  0xf1   : > { %v754_v14 = vpop.f32.mrb[3].mxu0 }
 0x122   : > { %v346_v18 = vpop.xlane.xlu0 %345 }
 0x123   : > { %vm347_vm3 = vcmp.eq.f32.partialorder %v346_v18, 0.0 }
 0x124   : > { %v350_v19 = vsel %vm347_vm3, 1.0, %v342_v9 }
 0x125   : > { %vm351_vm5 = vcmp.eq.f32.partialorder %v350_v19, 0.0 }
 0x126   : > { %v352_v20 = vsel %vm351_vm5, -inf, %v838_v1  ;;  %v542_v48 = vpop.permute.xlu0 %541 }
 0x127   : > { %v361_v21 = vsel %vm360_vm4, -inf, %v352_v20  ;;  %v547_v49 = vsel %vm426_vm6, %v542_v48, 0 }
 0x128   : > { %v408_v22 = vadd.f32 %v407_v11, %v361_v21  ;;  %768 = vmatpush3.bf16.msra.mxu0 %v547_v49 }
 0x12a   : > { %v413_v23 = vsel %vm343_vm2, %v408_v22, -inf }
 0x12b   : > { %414 = vmax.xlane.f32.xlu1 %v413_v23 }
 0x13c   : > { %480 = vrot.lane.b32.xlu1 %v735_v24, %s840_s11 }
 0x140   : > { %475 = vrot.lane.b32.xlu1 %v734_v25, %s840_s11 }
 0x1b8   : > { %v415_v29 = vpop.xlane.xlu1 %414 }
 0x1b9   : > { %v416_v30 = vsub.f32 %v408_v22, %v415_v29 }
 0x1bb   : > { %v417_v31 = vmul.f32 1.442695, %v416_v30 }
 0x1bc   : > { %v481_v32 = vpop.permute.xlu1 %480 }
 0x1bd   : > { %805 = vpow2.f32 %v417_v31  ;;  %v486_v34 = vsel %vm366_vm1, %v481_v32, 0 }
 0x1c0   : > { %v476_v36 = vpop.permute.xlu1 %475 }
 0x1c7   : > { %v806_v33 = vpop.eup %805 }
 0x1c8   : > { %v422_v35 = vpack.c.bf16 %v806_v33, %v806_v33  ;;  %v419_v47 = vsel %vm343_vm2, %v806_v33, 0.0 }
 0x1ca   : > { %758 = vmatmul.mubr.msk.bf16.vlgmr.msra.gmra.mrb[0].mxu1 %vm343_vm2, %v422_v35 }
 0x1cb   : > { %762 = vmatpush3.bf16.xpose.msra.mxu1 %v486_v34  ;;  %763 = vmatprep.mubr.msk.bf16.mxu1 %vm839_vm0, %v838_v1 }
 0x1d2   : > { %764 = vmatmul.mubr.msk.bf16.vlgmr.msra.gmra.mrb[4].mxu1 %vm366_vm1, %v476_v36 }
 0x29d   : > { %v464_v37 = vpop.f32.mrb[0].mxu1 }
 0x29e   : > { %v759_v38 = vpop.f32.mrb[1].mxu1 }
 0x29f   : > { %v467_v39 = vpop.f32.mrb[2].mxu1 }
 0x2a0   : > { %v760_v40 = vpop.f32.mrb[3].mxu1 }
 0x2a5   : > { %v522_v41 = vpop.f32.mrb[4].mxu1 }
 0x2a6   : > { %v523_v42 = vadd.f32 %v522_v41, %v361_v21  ;;  %v765_v43 = vpop.f32.mrb[5].mxu1 }
 0x2a7   : > { %v525_v44 = vpop.f32.mrb[6].mxu1 }
 0x2a8   : > { %v766_v45 = vpop.f32.mrb[7].mxu1  ;;  %v528_v46 = vsel %vm343_vm2, %v523_v42, -inf }
 0x2a9   : > { %529 = vmax.xlane.f32.xlu1 %v528_v46 }
 0x2ad   : > { %420 = vadd.xlane.f32.xlu1 %v419_v47 }
 0x336   : > { %v530_v50 = vpop.xlane.xlu1 %529 }
 0x337   : > { %v531_v51 = vsub.f32 %v523_v42, %v530_v50 }
 0x339   : > { %v532_v52 = vmul.f32 1.442695, %v531_v51 }
 0x33a   : > { %v421_v63 = vpop.xlane.xlu1 %420 }
 0x33b   : > { %807 = vpow2.f32 %v532_v52 }
 0x345   : > { %v808_v53 = vpop.eup %807 }
 0x346   : > { %v534_v54 = vsel %vm343_vm2, %v808_v53, 0.0  ;;  %v537_v55 = vpack.c.bf16 %v808_v53, %v808_v53 }
 0x347   : > { %535 = vadd.xlane.f32.xlu0 %v534_v54 }
 0x348   : > { %770 = vmatmul.mubr.msk.bf16.vlgmr.msra.gmra.mrb[4].mxu0 %vm343_vm2, %v537_v55 }
 0x3d4   : > { %v536_v56 = vpop.xlane.xlu0 %535 }
 0x3d5   : > { %809 = vrcp.f32 %v536_v56 }
 0x3d6   : > { %811 = vrcp.f32 %v421_v63 }
 0x3df   : > { %v810_v57 = vpop.eup %809 }
 0x3e0   : > { %v812_v0 = vpop.eup %811 }
 0x3e1   : > { %v471_v1 = vmul.f32 %v812_v0, %v464_v37 }
 0x41b   : > { %v583_v58 = vpop.f32.mrb[4].mxu0 }
 0x41c   : > { %v590_v59 = vmul.f32 %v810_v57, %v583_v58  ;;  %v771_v60 = vpop.f32.mrb[5].mxu0 }
 0x41d   : > { %v586_v61 = vpop.f32.mrb[6].mxu0 }
 0x41e   : > { %v772_v62 = vpop.f32.mrb[7].mxu0  ;;  %592 = vrot.lane.b32.xlu1 %v590_v59, %s841_s15 }
 0x490   : > { %v593_v2 = vpop.permute.xlu1 %592 }
 0x491   : > { %v595_v3 = vsel %vm366_vm1, %v471_v1, %v593_v2 }
 0x492   : > { %v596_v4 = vpack.c.bf16 %v595_v3, %v595_v3 }
 0x494   : > { %598 = vst.msk [vmem:[%s326_s18] sm:$0xf] %vm597_vm7, %v596_v4 }
 0x495 PF: > { %s15_s20 = sadd.s32 1, %s835_s20   ;;  %s956_s18 = smov %s831_s19 }
 0x496   : > { %p12_p5 = scmp.ge.s32.totalorder %s15_s20, 4   ;;  %s957_s19 = smov %s959_s21 }
 0x498   :  { %14 = sbr.rel (!%p12_p5) target bundleno = 2 (0x2), region = 82 }

// kernel: transformer_forward.49
= control target key start
LH: loop header
LB: loop body
LE: loop exit
PB: predicated region body
PF: predicated region fallthrough
CT: control target
= control target key end

     0   :  { %v152_v1 = vmov 0.0   ;;  %vm153_vm0 = vmmov 0   ;;  %s204_s0 = inlined_call_operand.vmem [shape: f32[16,32], index: 0, kind: input, shape index: {}]   ;;  %s205_s1 = inlined_call_operand.vmem [shape: bf16[32,64], index: 1, kind: input, shape index: {}]   ;;  %s206_s2 = inlined_call_operand.vmem [shape: f32[1,64], index: 2, kind: input, shape index: {}]   ;;  %s207_s3 = inlined_call_operand.hbm [shape: f32[16,64], index: 3, kind: output, shape index: {}]  }
   0x1   :  { %v126_v0 = vld [vmem:[%s205_s1] sm:$0xff]   ;;  %113 = vmatprep.subr.bf16.mxu0 %v152_v1  ;;  %v127_v2 = vld [vmem:[%s205_s1 + $0x8] sm:$0xff]   ;;  %117 = vmatprep.mubr.msk.bf16.mxu0 %vm153_vm0, %v152_v1 }
   0x2   :  { %114 = vmatpush3.bf16.msra.mxu0 %v126_v0  ;;  %v16_v3 = vld [vmem:[%s204_s0] sm:$0xff]  ;;  %v17_v4 = vld [vmem:[%s204_s0 + $0x8] sm:$0xff] }
   0x3   :  { %115 = vmatprep.subr.bf16.mxu0 %v152_v1 }
   0x4   :  { %8 = vsyncpa [#allocation3], 0  ;;  %v18_v5 = vpack.c.bf16 %v17_v4, %v16_v3  ;;  %vm42_vm1 = vcmask 261120   ;;  %v106_v6 = vld [vmem:[%s206_s2] ss:$0 sm:$0xff]  ;;  %s154_s1 = smov [#allocation2]  }
   0x5   :  { %s95_s22 = sshll.u32 %s154_s1, 4  ;;  %vm87_vm2 = vcmask 523264   ;;  %s96_s22 = int_to_ptr.vmem [resolvable:$true] %s95_s22 }
   0x6   :  { %116 = vmatpush3.bf16.msra.mxu0 %v127_v2  ;;  %s128_s0 = scalar_lea.vmem %s96_s22, 256  ;;  %p133_p1 = scmp.lt.s32.totalorder %s96_s22, %s96_s22 }
   0x7   :  { %p129_p0 = scmp.ne.s32.totalorder %s96_s22, %s128_s0  ;;  %p134_p2 = scmp.lt.s32.totalorder %s128_s0, %s128_s0 }
   0x9   :  { %118 = vmatmul.mubr.msk.bf16.vlgmr.msra.gmra.mrb[0].mxu0 %vm42_vm1, %v18_v5  ;;  %p135_p3 = por %p134_p2, %p133_p1 }
   0xb   :  { %p136_p4 = pnand %p135_p3, %p129_p0 }
  0xdc   :  { %v80_v7 = vpop.f32.mrb[0].mxu0 }
  0xdd   :  { %v81_v8 = vadd.f32 %v106_v6, %v80_v7  ;;  %v119_v9 = vpop.f32.mrb[1].mxu0 }
  0xde   :  { %v83_v10 = vpop.f32.mrb[2].mxu0 }
  0xdf   :  { %88 = vst.msk [vmem:[#allocation2] sm:$0xff] %vm87_vm2, %v81_v8  ;;  %v84_v11 = vadd.f32 %v106_v6, %v83_v10  ;;  %v120_v12 = vpop.f32.mrb[3].mxu0 }
  0xe1   :  { %89 = vst.msk [vmem:[#allocation2 + $0x8] sm:$0xff] %vm87_vm2, %v84_v11 }
  0xe2   :  { %139 = shalt.err (!%p136_p4)
}
  0xe3   :  { %s140_s24 = scalar_lea.hbm %s207_s3, 256 }
  0xe4   :  { %p141_p5 = scmp.ne.s32.totalorder %s207_s3, %s140_s24  ;;  %p144_p6 = scmp.lt.u32.totalorder %s140_s24, %s207_s3 }
  0xe6   :  { %p146_p7 = pnand %p144_p6, %p141_p5 }
  0xe8   :  { %149 = shalt.err (!%p146_p7)
}
  0xe9   :  { %s155_s29 = smov 128   ;;  %s156_s30 = smov 8  }
  0xea   :  { %101 = dma.vmem_to_hbm [thread:$0]  %s96_s22, 256, %s207_s3, [#allocation3], %s155_s29, %s155_s29, %s156_s30  }
  0xeb   :  { %150 = dma.done.wait [#allocation3], 256  }
  0xec   :  { %151 = vsyncadd [#allocation3], 4294967040 }
  0xed   :  { %105 = vsyncpa [#allocation3], 1 }

</bundles_post_ra>
